<compile_context>
chip_gen: v7x
topology: tpu7x:2x2x1
jax: 0.10.0
libtpu: 0.0.40
codegen_flags: <defaults>
</compile_context>

<pallas_src>
import functools

import jax
import jax.numpy as jnp
from jax import lax
from jax.experimental import pallas as pl
from jax.experimental.pallas import tpu as pltpu


# ----------------------------- Pallas kernel ------------------------------ #

def bilstm_kernel(len_ref, gx_ref, whhT_ref, out_ref, hn_ref, cn_ref,
                  h_sc, c_sc, *, Tc, Hp, nch):
    """One (direction, time-chunk) grid step of a bidirectional LSTM.

    len_ref : (Bp, Hp)      int32   sequence lengths broadcast across lanes
    gx_ref  : (Tc, Bp, 4Hp) bf16    precomputed x @ W_ih^T + b for this chunk
    whhT_ref: (Hp, 4Hp)     bf16    recurrent weights for this direction
    out_ref : (Tc, Bp, Hp)  f32     this direction's half of the output slab
    hn_ref/cn_ref: (Bp, Hp) f32     final state for this direction
    h_sc/c_sc: (Bp, Hp)     f32     recurrent state, persists across chunks
    """
    d = pl.program_id(0)     # direction: 0 = forward, 1 = backward
    tc = pl.program_id(1)    # time-chunk index (processing order)

    @pl.when(tc == 0)
    def _():
        h_sc[...] = jnp.zeros_like(h_sc)
        c_sc[...] = jnp.zeros_like(c_sc)

    lens = len_ref[...]                       # (Bp, Hp) int32
    w_hh = whhT_ref[...]                      # (Hp, 4Hp) bf16, VMEM-resident
    blk = tc + d * (nch - 1 - 2 * tc)         # original time-block index
    base = blk * Tc                           # original time offset of chunk

    def step(i, carry):
        h, c = carry                          # f32 (Bp, Hp)
        row = i + d * (Tc - 1 - 2 * i)        # fwd: i ; bwd: Tc-1-i
        pos = base + row                      # position in original sequence

        # Only the recurrent matmul stays on the serial critical path.
        gates = (gx_ref[row].astype(jnp.float32)
                 + jnp.dot(h.astype(jnp.bfloat16), w_hh,
                           preferred_element_type=jnp.float32))  # (Bp, 4Hp)

        # packed gate order [i, f, o, g]: one wide sigmoid pass + one tanh pass;
        # all slices are 128-lane-aligned views (Hp % 128 == 0).
        act = jax.nn.sigmoid(gates[:, 0:3 * Hp])
        i_g = act[:, 0 * Hp:1 * Hp]
        f_g = act[:, 1 * Hp:2 * Hp]
        o_g = act[:, 2 * Hp:3 * Hp]
        g_g = jnp.tanh(gates[:, 3 * Hp:4 * Hp])

        c_new = f_g * c + i_g * g_g
        h_new = o_g * jnp.tanh(c_new)

        mask = lens > pos                     # packed-sequence validity
        out_ref[row] = jnp.where(mask, h_new, 0.0).astype(out_ref.dtype)
        return (jnp.where(mask, h_new, h), jnp.where(mask, c_new, c))

    h, c = lax.fori_loop(0, Tc, step, (h_sc[...], c_sc[...]), unroll=True)
    h_sc[...] = h
    c_sc[...] = c

    @pl.when(tc == nch - 1)                   # write finals only once
    def _():
        hn_ref[...] = h
        cn_ref[...] = c


def bilstm_pallas(lens, gx, whhT, *, Tc, Hp, Bp, Tp, nch):
    kernel = functools.partial(bilstm_kernel, Tc=Tc, Hp=Hp, nch=nch)

    def tblk(d, tc):
        # original time-block index; backward dir walks the chunks in reverse
        return tc + d * (nch - 1 - 2 * tc)

    # NOTE: whhT / lens have constant index maps; at these sizes default
    # double-buffering is harmless.  For large H on v7x (64 MiB VMEM), mark
    # them pipeline_mode=pl.Buffered(1) and re-budget the time chunk.
    out, hn, cn = pl.pallas_call(
        kernel,
        out_shape=(jax.ShapeDtypeStruct((Tp, Bp, 2 * Hp), jnp.float32),
                   jax.ShapeDtypeStruct((2, Bp, Hp), jnp.float32),
                   jax.ShapeDtypeStruct((2, Bp, Hp), jnp.float32)),
        grid=(2, nch),
        in_specs=[
            pl.BlockSpec((Bp, Hp), lambda d, tc: (0, 0)),                 # lengths
            pl.BlockSpec((None, Tc, Bp, 4 * Hp),
                         lambda d, tc: (d, tblk(d, tc), 0, 0)),           # gate inputs
            pl.BlockSpec((None, Hp, 4 * Hp), lambda d, tc: (d, 0, 0)),    # W_hh^T
        ],
        out_specs=(
            pl.BlockSpec((Tc, Bp, Hp), lambda d, tc: (tblk(d, tc), 0, d)),  # outputs
            pl.BlockSpec((None, Bp, Hp), lambda d, tc: (d, 0, 0)),          # h_n
            pl.BlockSpec((None, Bp, Hp), lambda d, tc: (d, 0, 0)),          # c_n
        ),
        scratch_shapes=[pltpu.VMEM((Bp, Hp), jnp.float32),    # h state
                        pltpu.VMEM((Bp, Hp), jnp.float32)],   # c state
        compiler_params=pltpu.CompilerParams(
            dimension_semantics=("parallel", "arbitrary")),
    )(lens, gx, whhT)
    return out, hn, cn


# ------------------------- weight packing helpers -------------------------- #

def _round_up(x, m):
    return ((x + m - 1) // m) * m


_GATE_PERM = (0, 1, 3, 2)   # torch order [i, f, g, o]  ->  packed [i, f, o, g]


def _pack_w_T(w, H, Hp):
    """(4H, H) torch LSTM weight -> transposed, gate-blocked, lane-padded (Hp, 4Hp)."""
    out = jnp.zeros((Hp, 4 * Hp), jnp.float32)
    wT = jnp.transpose(w).astype(jnp.float32)          # (H, 4H)
    for k, g in enumerate(_GATE_PERM):
        out = out.at[:H, k * Hp:k * Hp + H].set(wT[:, g * H:(g + 1) * H])
    return out


def _pack_bias(b, H, Hp):
    out = jnp.zeros((4 * Hp,), jnp.float32)
    for k, g in enumerate(_GATE_PERM):
        out = out.at[k * Hp:k * Hp + H].set(b[g * H:(g + 1) * H].astype(jnp.float32))
    return out


# ------------------------- EncoderRNN forward (glue) ----------------------- #

def encoder_rnn_forward(params, input_seqs, input_lengths, *, time_chunk=8):
    """input_seqs: (B, T) int32 token ids; input_lengths: (B,) int32."""
    B, T = input_seqs.shape
    H = params["embedding"].shape[1]
    Hp = _round_up(H, 128)            # lane-aligned hidden size
    Bp = _round_up(B, 8)              # sublane-aligned batch
    Tc = time_chunk
    nch = (T + Tc - 1) // Tc
    Tp = nch * Tc

    # Embedding lookup (gather) stays in plain XLA in the wrapper.
    emb = jnp.take(params["embedding"], input_seqs, axis=0).astype(jnp.float32)  # (B,T,H)
    x = jnp.transpose(emb, (1, 0, 2))                                            # (T,B,H)
    x = jnp.pad(x, ((0, Tp - T), (0, Bp - B), (0, Hp - H)))                      # (Tp,Bp,Hp)

    # Packed, padded weights.  Padded hidden units get zero weights/bias, so
    # they stay exactly zero and never feed back into the real units.
    wihT = [_pack_w_T(params["w_ih_f"], H, Hp), _pack_w_T(params["w_ih_b"], H, Hp)]
    whhT = jnp.stack([_pack_w_T(params["w_hh_f"], H, Hp),
                      _pack_w_T(params["w_hh_b"], H, Hp)]).astype(jnp.bfloat16)
    bias = [_pack_bias(params["b_ih_f"] + params["b_hh_f"], H, Hp),
            _pack_bias(params["b_ih_b"] + params["b_hh_b"], H, Hp)]

    # Hoisted time-parallel input projection: one big (Tp*Bp, Hp)x(Hp, 4Hp)
    # matmul per direction, streamed to the kernel in bf16.
    xf = x.reshape(Tp * Bp, Hp)
    gx = jnp.stack([
        (jnp.dot(xf, wihT[d], precision=jax.lax.Precision.HIGHEST)
         + bias[d]).reshape(Tp, Bp, 4 * Hp)
        for d in range(2)
    ]).astype(jnp.bfloat16)                                   # (2, Tp, Bp, 4Hp)

    # Lengths broadcast across lanes so the per-step mask is a single wide
    # VPU compare (no per-step lane broadcast of a (B,1) column).
    lens = jnp.zeros((Bp, Hp), jnp.int32).at[:B, :].set(
        jnp.broadcast_to(input_lengths.astype(jnp.int32)[:, None], (B, Hp)))

    out_pad, hn_pad, cn_pad = bilstm_pallas(lens, gx, whhT, Tc=Tc, Hp=Hp,
                                            Bp=Bp, Tp=Tp, nch=nch)

    out_f = out_pad[:T, :B, :H]
    out_b = out_pad[:T, :B, Hp:Hp + H]
    outputs = jnp.transpose(jnp.concatenate([out_f, out_b], axis=-1), (1, 0, 2))  # (B,T,2H)
    h_n = hn_pad[:, :B, :H]                                    # (2, B, H)
    c_n = cn_pad[:, :B, :H]                                    # (2, B, H)
    return outputs, (h_n, c_n)


# ----------------------------- pure-JAX reference -------------------------- #

def _ref_direction(x_tbh, lengths, w_ih, w_hh, b_ih, b_hh, reverse):
    T, B, H = x_tbh.shape
    hi = jax.lax.Precision.HIGHEST

    def step(carry, inp):
        xt, pos = inp
        h, c = carry
        gates = (jnp.dot(xt, w_ih.T, precision=hi)
                 + jnp.dot(h, w_hh.T, precision=hi) + b_ih + b_hh)
        i_g = jax.nn.sigmoid(gates[:, 0 * H:1 * H])
        f_g = jax.nn.sigmoid(gates[:, 1 * H:2 * H])
        g_g = jnp.tanh(gates[:, 2 * H:3 * H])
        o_g = jax.nn.sigmoid(gates[:, 3 * H:4 * H])
        c_new = f_g * c + i_g * g_g
        h_new = o_g * jnp.tanh(c_new)
        mask = (lengths > pos)[:, None]
        h_u = jnp.where(mask, h_new, h)
        c_u = jnp.where(mask, c_new, c)
        out = jnp.where(mask, h_new, 0.0)
        return (h_u, c_u), out

    if reverse:
        xs = x_tbh[::-1]
        pos = jnp.arange(T - 1, -1, -1)
    else:
        xs = x_tbh
        pos = jnp.arange(T)
    init = (jnp.zeros((B, H), jnp.float32), jnp.zeros((B, H), jnp.float32))
    (h, c), outs = lax.scan(step, init, (xs, pos))
    if reverse:
        outs = outs[::-1]
    return outs, h, c


def encoder_rnn_reference(params, input_seqs, input_lengths):
    emb = jnp.take(params["embedding"], input_seqs, axis=0)
    x = jnp.transpose(emb, (1, 0, 2)).astype(jnp.float32)
    out_f, h_f, c_f = _ref_direction(x, input_lengths, params["w_ih_f"],
                                     params["w_hh_f"], params["b_ih_f"],
                                     params["b_hh_f"], reverse=False)
    out_b, h_b, c_b = _ref_direction(x, input_lengths, params["w_ih_b"],
                                     params["w_hh_b"], params["b_ih_b"],
                                     params["b_hh_b"], reverse=True)
    outputs = jnp.transpose(jnp.concatenate([out_f, out_b], -1), (1, 0, 2))
    return outputs, (jnp.stack([h_f, h_b]), jnp.stack([c_f, c_b]))


# ----------------------------------- main ---------------------------------- #

if __name__ == "__main__":
    vocab_size, hidden, batch, seq = 20, 32, 4, 12

    key = jax.random.PRNGKey(0)
    ks = jax.random.split(key, 10)
    s = 1.0 / float(hidden) ** 0.5

    def uni(k, shape):
        return jax.random.uniform(k, shape, jnp.float32, -s, s)

    params = {
        "embedding": jax.random.normal(ks[0], (vocab_size, hidden), jnp.float32),
        "w_ih_f": uni(ks[1], (4 * hidden, hidden)),
        "w_hh_f": uni(ks[2], (4 * hidden, hidden)),
        "b_ih_f": uni(ks[3], (4 * hidden,)),
        "b_hh_f": uni(ks[4], (4 * hidden,)),
        "w_ih_b": uni(ks[5], (4 * hidden, hidden)),
        "w_hh_b": uni(ks[6], (4 * hidden, hidden)),
        "b_ih_b": uni(ks[7], (4 * hidden,)),
        "b_hh_b": uni(ks[8], (4 * hidden,)),
    }

    input_seqs = jax.random.randint(ks[9], (batch, seq), 0, vocab_size,
                                    dtype=jnp.int32)
    input_lengths = jnp.array([12, 7, 10, 3], dtype=jnp.int32)

    outputs, (h_n, c_n) = encoder_rnn_forward(params, input_seqs, input_lengths,
                                              time_chunk=8)
    jax.block_until_ready((outputs, h_n, c_n))

    # pad_packed_sequence returns length = max(input_lengths)
    t_out = int(jnp.max(input_lengths))
    outputs = outputs[:, :t_out]

    ref_out, (ref_h, ref_c) = encoder_rnn_reference(params, input_seqs,
                                                    input_lengths)
    ref_out = ref_out[:, :t_out]

    assert outputs.shape == (batch, t_out, 2 * hidden)
    assert h_n.shape == (2, batch, hidden) and c_n.shape == (2, batch, hidden)
    # kernel runs bf16 matmul inputs (f32 accumulation) vs a pure-f32 reference
    tol = dict(atol=2e-2, rtol=2e-2)
    assert jnp.allclose(outputs, ref_out, **tol)
    assert jnp.allclose(h_n, ref_h, **tol)
    assert jnp.allclose(c_n, ref_c, **tol)

    print("KERNEL_OK")
</pallas_src>

<mosaic_0001>
module attributes {stable_mosaic.version = 11 : i64} {
  func.func @bilstm_kernel(%arg0: i32, %arg1: i32, %arg2: memref<8x128xi32, #tpu.memory_space<vmem>>, %arg3: memref<1x8x8x512xbf16, #tpu.memory_space<vmem>>, %arg4: memref<1x128x512xbf16, #tpu.memory_space<vmem>>, %arg5: memref<8x8x128xf32, #tpu.memory_space<vmem>>, %arg6: memref<1x8x128xf32, #tpu.memory_space<vmem>>, %arg7: memref<1x8x128xf32, #tpu.memory_space<vmem>>, %arg8: memref<8x128xf32, #tpu.memory_space<vmem>>, %arg9: memref<8x128xf32, #tpu.memory_space<vmem>>) attributes {dimension_semantics = [#tpu.dimension_semantics<parallel>, #tpu.dimension_semantics<arbitrary>], iteration_bounds = array<i64: 2, 2>, scalar_prefetch = 0 : i64, scratch_operands = 2 : i64, tpu.core_type = #tpu.core_type<tc>, window_params = [{pipeline_mode = #tpu.pipeline_mode<synchronous>, transform_indices = @transform_0, window_bounds = array<i64: 8, 128>}, {transform_indices = @transform_1, window_bounds = array<i64: 1, 8, 8, 512>}, {transform_indices = @transform_2, window_bounds = array<i64: 1, 128, 512>}, {transform_indices = @transform_3, window_bounds = array<i64: 8, 8, 128>}, {transform_indices = @transform_4, window_bounds = array<i64: 1, 8, 128>}, {transform_indices = @transform_5, window_bounds = array<i64: 1, 8, 128>}]} {
    %c0_i32 = arith.constant 0 : i32
    %0 = arith.cmpi eq, %arg1, %c0_i32 : i32
    %1 = arith.extui %0 : i1 to i32
    %c0_i32_0 = arith.constant 0 : i32
    %2 = arith.cmpi ne, %1, %c0_i32_0 : i32
    scf.if %2 {
      %cst_98 = arith.constant 0.000000e+00 : f32
      %322 = vector.broadcast %cst_98 : f32 to vector<8x128xf32>
      %c0_99 = arith.constant 0 : index
      %c0_100 = arith.constant 0 : index
      %323 = vector.load %arg8[%c0_99, %c0_100] : memref<8x128xf32, #tpu.memory_space<vmem>>, vector<8x128xf32>
      tpu.vector_store %arg8[%c0_99, %c0_100], %322 {strides = array<i32>} : memref<8x128xf32, #tpu.memory_space<vmem>>, vector<8x128xf32>,
      %cst_101 = arith.constant 0.000000e+00 : f32
      %324 = vector.broadcast %cst_101 : f32 to vector<8x128xf32>
      %c0_102 = arith.constant 0 : index
      %c0_103 = arith.constant 0 : index
      %325 = vector.load %arg9[%c0_102, %c0_103] : memref<8x128xf32, #tpu.memory_space<vmem>>, vector<8x128xf32>
      tpu.vector_store %arg9[%c0_102, %c0_103], %324 {strides = array<i32>} : memref<8x128xf32, #tpu.memory_space<vmem>>, vector<8x128xf32>,
    } else {
    }
    %c0 = arith.constant 0 : index
    %c0_1 = arith.constant 0 : index
    %3 = vector.load %arg2[%c0, %c0_1] : memref<8x128xi32, #tpu.memory_space<vmem>>, vector<8x128xi32>
    %c0_2 = arith.constant 0 : index
    %c0_3 = arith.constant 0 : index
    %c0_4 = arith.constant 0 : index
    %4 = vector.load %arg4[%c0_2, %c0_3, %c0_4] : memref<1x128x512xbf16, #tpu.memory_space<vmem>>, vector<1x128x512xbf16>
    %5 = vector.shape_cast %4 : vector<1x128x512xbf16> to vector<128x512xbf16>
    %c2_i32 = arith.constant 2 : i32
    %6 = arith.muli %c2_i32, %arg1 : i32
    %c1_i32 = arith.constant 1 : i32
    %7 = arith.subi %c1_i32, %6 : i32
    %8 = arith.muli %arg0, %7 : i32
    %9 = arith.addi %arg1, %8 : i32
    %c8_i32 = arith.constant 8 : i32
    %10 = arith.muli %9, %c8_i32 : i32
    %c0_5 = arith.constant 0 : index
    %c0_6 = arith.constant 0 : index
    %11 = vector.load %arg8[%c0_5, %c0_6] : memref<8x128xf32, #tpu.memory_space<vmem>>, vector<8x128xf32>
    %c0_7 = arith.constant 0 : index
    %c0_8 = arith.constant 0 : index
    %12 = vector.load %arg9[%c0_7, %c0_8] : memref<8x128xf32, #tpu.memory_space<vmem>>, vector<8x128xf32>
    %c0_i32_9 = arith.constant 0 : i32
    %c2_i32_10 = arith.constant 2 : i32
    %13 = arith.muli %c2_i32_10, %c0_i32_9 : i32
    %c7_i32 = arith.constant 7 : i32
    %14 = arith.subi %c7_i32, %13 : i32
    %15 = arith.muli %arg0, %14 : i32
    %16 = arith.addi %c0_i32_9, %15 : i32
    %17 = arith.addi %10, %16 : i32
    %c0_11 = arith.constant 0 : index
    %18 = arith.index_cast %16 : i32 to index
    %c0_12 = arith.constant 0 : index
    %c0_13 = arith.constant 0 : index
    %19 = vector.load %arg3[%c0_11, %18, %c0_12, %c0_13] : memref<1x8x8x512xbf16, #tpu.memory_space<vmem>>, vector<1x1x8x512xbf16>
    %20 = vector.shape_cast %19 : vector<1x1x8x512xbf16> to vector<8x512xbf16>
    %21 = arith.extf %20 : vector<8x512xbf16> to vector<8x512xf32>
    %22 = arith.truncf %11 : vector<8x128xf32> to vector<8x128xbf16>
    %cst = arith.constant dense<0.000000e+00> : vector<8x512xf32>
    %23 = tpu.matmul %22, %5, %cst {dimension_numbers = #tpu.dot_dimension_numbers<[1], [0], [0], [1], [0, 0, 1, 1], [], []>} : vector<8x128xbf16>, vector<128x512xbf16>, vector<8x512xf32> -> vector<8x512xf32>
    %24 = arith.addf %21, %23 : vector<8x512xf32>
    %25 = vector.extract_strided_slice %24 {offsets = [0, 0], sizes = [8, 384], strides = [1, 1]} : vector<8x512xf32> to vector<8x384xf32>
    %26 = arith.negf %25 : vector<8x384xf32>
    %27 = math.exp %26 : vector<8x384xf32>
    %cst_14 = arith.constant 1.000000e+00 : f32
    %28 = vector.broadcast %cst_14 : f32 to vector<8x384xf32>
    %29 = arith.addf %28, %27 : vector<8x384xf32>
    %30 = arith.divf %28, %29 : vector<8x384xf32>
    %31 = vector.extract_strided_slice %30 {offsets = [0, 0], sizes = [8, 128], strides = [1, 1]} : vector<8x384xf32> to vector<8x128xf32>
    %32 = vector.extract_strided_slice %30 {offsets = [0, 128], sizes = [8, 128], strides = [1, 1]} : vector<8x384xf32> to vector<8x128xf32>
    %33 = vector.extract_strided_slice %30 {offsets = [0, 256], sizes = [8, 128], strides = [1, 1]} : vector<8x384xf32> to vector<8x128xf32>
    %34 = vector.extract_strided_slice %24 {offsets = [0, 384], sizes = [8, 128], strides = [1, 1]} : vector<8x512xf32> to vector<8x128xf32>
    %35 = math.tanh %34 : vector<8x128xf32>
    %36 = arith.mulf %32, %12 : vector<8x128xf32>
    %37 = arith.mulf %31, %35 : vector<8x128xf32>
    %38 = arith.addf %36, %37 : vector<8x128xf32>
    %39 = math.tanh %38 : vector<8x128xf32>
    %40 = arith.mulf %33, %39 : vector<8x128xf32>
    %41 = vector.broadcast %17 : i32 to vector<8x128xi32>
    %42 = arith.cmpi sgt, %3, %41 : vector<8x128xi32>
    %cst_15 = arith.constant 0.000000e+00 : f32
    %43 = vector.broadcast %cst_15 : f32 to vector<8x128xf32>
    %44 = arith.select %42, %40, %43 : vector<8x128xi1>, vector<8x128xf32>
    %45 = arith.index_cast %16 : i32 to index
    %c0_16 = arith.constant 0 : index
    %c0_17 = arith.constant 0 : index
    %46 = vector.load %arg5[%45, %c0_16, %c0_17] : memref<8x8x128xf32, #tpu.memory_space<vmem>>, vector<1x8x128xf32>
    %47 = vector.shape_cast %46 : vector<1x8x128xf32> to vector<8x128xf32>
    %48 = vector.shape_cast %44 : vector<8x128xf32> to vector<1x8x128xf32>
    tpu.vector_store %arg5[%45, %c0_16, %c0_17], %48 {strides = array<i32>} : memref<8x8x128xf32, #tpu.memory_space<vmem>>, vector<1x8x128xf32>,
    %49 = arith.select %42, %40, %11 : vector<8x128xi1>, vector<8x128xf32>
    %50 = arith.select %42, %38, %12 : vector<8x128xi1>, vector<8x128xf32>
    %c1_i32_18 = arith.constant 1 : i32
    %c2_i32_19 = arith.constant 2 : i32
    %51 = arith.muli %c2_i32_19, %c1_i32_18 : i32
    %c7_i32_20 = arith.constant 7 : i32
    %52 = arith.subi %c7_i32_20, %51 : i32
    %53 = arith.muli %arg0, %52 : i32
    %54 = arith.addi %c1_i32_18, %53 : i32
    %55 = arith.addi %10, %54 : i32
    %c0_21 = arith.constant 0 : index
    %56 = arith.index_cast %54 : i32 to index
    %c0_22 = arith.constant 0 : index
    %c0_23 = arith.constant 0 : index
    %57 = vector.load %arg3[%c0_21, %56, %c0_22, %c0_23] : memref<1x8x8x512xbf16, #tpu.memory_space<vmem>>, vector<1x1x8x512xbf16>
    %58 = vector.shape_cast %57 : vector<1x1x8x512xbf16> to vector<8x512xbf16>
    %59 = arith.extf %58 : vector<8x512xbf16> to vector<8x512xf32>
    %60 = arith.truncf %49 : vector<8x128xf32> to vector<8x128xbf16>
    %cst_24 = arith.constant dense<0.000000e+00> : vector<8x512xf32>
    %61 = tpu.matmul %60, %5, %cst_24 {dimension_numbers = #tpu.dot_dimension_numbers<[1], [0], [0], [1], [0, 0, 1, 1], [], []>} : vector<8x128xbf16>, vector<128x512xbf16>, vector<8x512xf32> -> vector<8x512xf32>
    %62 = arith.addf %59, %61 : vector<8x512xf32>
    %63 = vector.extract_strided_slice %62 {offsets = [0, 0], sizes = [8, 384], strides = [1, 1]} : vector<8x512xf32> to vector<8x384xf32>
    %64 = arith.negf %63 : vector<8x384xf32>
    %65 = math.exp %64 : vector<8x384xf32>
    %cst_25 = arith.constant 1.000000e+00 : f32
    %66 = vector.broadcast %cst_25 : f32 to vector<8x384xf32>
    %67 = arith.addf %66, %65 : vector<8x384xf32>
    %68 = arith.divf %66, %67 : vector<8x384xf32>
    %69 = vector.extract_strided_slice %68 {offsets = [0, 0], sizes = [8, 128], strides = [1, 1]} : vector<8x384xf32> to vector<8x128xf32>
    %70 = vector.extract_strided_slice %68 {offsets = [0, 128], sizes = [8, 128], strides = [1, 1]} : vector<8x384xf32> to vector<8x128xf32>
    %71 = vector.extract_strided_slice %68 {offsets = [0, 256], sizes = [8, 128], strides = [1, 1]} : vector<8x384xf32> to vector<8x128xf32>
    %72 = vector.extract_strided_slice %62 {offsets = [0, 384], sizes = [8, 128], strides = [1, 1]} : vector<8x512xf32> to vector<8x128xf32>
    %73 = math.tanh %72 : vector<8x128xf32>
    %74 = arith.mulf %70, %50 : vector<8x128xf32>
    %75 = arith.mulf %69, %73 : vector<8x128xf32>
    %76 = arith.addf %74, %75 : vector<8x128xf32>
    %77 = math.tanh %76 : vector<8x128xf32>
    %78 = arith.mulf %71, %77 : vector<8x128xf32>
    %79 = vector.broadcast %55 : i32 to vector<8x128xi32>
    %80 = arith.cmpi sgt, %3, %79 : vector<8x128xi32>
    %cst_26 = arith.constant 0.000000e+00 : f32
    %81 = vector.broadcast %cst_26 : f32 to vector<8x128xf32>
    %82 = arith.select %80, %78, %81 : vector<8x128xi1>, vector<8x128xf32>
    %83 = arith.index_cast %54 : i32 to index
    %c0_27 = arith.constant 0 : index
    %c0_28 = arith.constant 0 : index
    %84 = vector.load %arg5[%83, %c0_27, %c0_28] : memref<8x8x128xf32, #tpu.memory_space<vmem>>, vector<1x8x128xf32>
    %85 = vector.shape_cast %84 : vector<1x8x128xf32> to vector<8x128xf32>
    %86 = vector.shape_cast %82 : vector<8x128xf32> to vector<1x8x128xf32>
    tpu.vector_store %arg5[%83, %c0_27, %c0_28], %86 {strides = array<i32>} : memref<8x8x128xf32, #tpu.memory_space<vmem>>, vector<1x8x128xf32>,
    %87 = arith.select %80, %78, %49 : vector<8x128xi1>, vector<8x128xf32>
    %88 = arith.select %80, %76, %50 : vector<8x128xi1>, vector<8x128xf32>
    %c2_i32_29 = arith.constant 2 : i32
    %c2_i32_30 = arith.constant 2 : i32
    %89 = arith.muli %c2_i32_30, %c2_i32_29 : i32
    %c7_i32_31 = arith.constant 7 : i32
    %90 = arith.subi %c7_i32_31, %89 : i32
    %91 = arith.muli %arg0, %90 : i32
    %92 = arith.addi %c2_i32_29, %91 : i32
    %93 = arith.addi %10, %92 : i32
    %c0_32 = arith.constant 0 : index
    %94 = arith.index_cast %92 : i32 to index
    %c0_33 = arith.constant 0 : index
    %c0_34 = arith.constant 0 : index
    %95 = vector.load %arg3[%c0_32, %94, %c0_33, %c0_34] : memref<1x8x8x512xbf16, #tpu.memory_space<vmem>>, vector<1x1x8x512xbf16>
    %96 = vector.shape_cast %95 : vector<1x1x8x512xbf16> to vector<8x512xbf16>
    %97 = arith.extf %96 : vector<8x512xbf16> to vector<8x512xf32>
    %98 = arith.truncf %87 : vector<8x128xf32> to vector<8x128xbf16>
    %cst_35 = arith.constant dense<0.000000e+00> : vector<8x512xf32>
    %99 = tpu.matmul %98, %5, %cst_35 {dimension_numbers = #tpu.dot_dimension_numbers<[1], [0], [0], [1], [0, 0, 1, 1], [], []>} : vector<8x128xbf16>, vector<128x512xbf16>, vector<8x512xf32> -> vector<8x512xf32>
    %100 = arith.addf %97, %99 : vector<8x512xf32>
    %101 = vector.extract_strided_slice %100 {offsets = [0, 0], sizes = [8, 384], strides = [1, 1]} : vector<8x512xf32> to vector<8x384xf32>
    %102 = arith.negf %101 : vector<8x384xf32>
    %103 = math.exp %102 : vector<8x384xf32>
    %cst_36 = arith.constant 1.000000e+00 : f32
    %104 = vector.broadcast %cst_36 : f32 to vector<8x384xf32>
    %105 = arith.addf %104, %103 : vector<8x384xf32>
    %106 = arith.divf %104, %105 : vector<8x384xf32>
    %107 = vector.extract_strided_slice %106 {offsets = [0, 0], sizes = [8, 128], strides = [1, 1]} : vector<8x384xf32> to vector<8x128xf32>
    %108 = vector.extract_strided_slice %106 {offsets = [0, 128], sizes = [8, 128], strides = [1, 1]} : vector<8x384xf32> to vector<8x128xf32>
    %109 = vector.extract_strided_slice %106 {offsets = [0, 256], sizes = [8, 128], strides = [1, 1]} : vector<8x384xf32> to vector<8x128xf32>
    %110 = vector.extract_strided_slice %100 {offsets = [0, 384], sizes = [8, 128], strides = [1, 1]} : vector<8x512xf32> to vector<8x128xf32>
    %111 = math.tanh %110 : vector<8x128xf32>
    %112 = arith.mulf %108, %88 : vector<8x128xf32>
    %113 = arith.mulf %107, %111 : vector<8x128xf32>
    %114 = arith.addf %112, %113 : vector<8x128xf32>
    %115 = math.tanh %114 : vector<8x128xf32>
    %116 = arith.mulf %109, %115 : vector<8x128xf32>
    %117 = vector.broadcast %93 : i32 to vector<8x128xi32>
    %118 = arith.cmpi sgt, %3, %117 : vector<8x128xi32>
    %cst_37 = arith.constant 0.000000e+00 : f32
    %119 = vector.broadcast %cst_37 : f32 to vector<8x128xf32>
    %120 = arith.select %118, %116, %119 : vector<8x128xi1>, vector<8x128xf32>
    %121 = arith.index_cast %92 : i32 to index
    %c0_38 = arith.constant 0 : index
    %c0_39 = arith.constant 0 : index
    %122 = vector.load %arg5[%121, %c0_38, %c0_39] : memref<8x8x128xf32, #tpu.memory_space<vmem>>, vector<1x8x128xf32>
    %123 = vector.shape_cast %122 : vector<1x8x128xf32> to vector<8x128xf32>
    %124 = vector.shape_cast %120 : vector<8x128xf32> to vector<1x8x128xf32>
    tpu.vector_store %arg5[%121, %c0_38, %c0_39], %124 {strides = array<i32>} : memref<8x8x128xf32, #tpu.memory_space<vmem>>, vector<1x8x128xf32>,
    %125 = arith.select %118, %116, %87 : vector<8x128xi1>, vector<8x128xf32>
    %126 = arith.select %118, %114, %88 : vector<8x128xi1>, vector<8x128xf32>
    %c3_i32 = arith.constant 3 : i32
    %c2_i32_40 = arith.constant 2 : i32
    %127 = arith.muli %c2_i32_40, %c3_i32 : i32
    %c7_i32_41 = arith.constant 7 : i32
    %128 = arith.subi %c7_i32_41, %127 : i32
    %129 = arith.muli %arg0, %128 : i32
    %130 = arith.addi %c3_i32, %129 : i32
    %131 = arith.addi %10, %130 : i32
    %c0_42 = arith.constant 0 : index
    %132 = arith.index_cast %130 : i32 to index
    %c0_43 = arith.constant 0 : index
    %c0_44 = arith.constant 0 : index
    %133 = vector.load %arg3[%c0_42, %132, %c0_43, %c0_44] : memref<1x8x8x512xbf16, #tpu.memory_space<vmem>>, vector<1x1x8x512xbf16>
    %134 = vector.shape_cast %133 : vector<1x1x8x512xbf16> to vector<8x512xbf16>
    %135 = arith.extf %134 : vector<8x512xbf16> to vector<8x512xf32>
    %136 = arith.truncf %125 : vector<8x128xf32> to vector<8x128xbf16>
    %cst_45 = arith.constant dense<0.000000e+00> : vector<8x512xf32>
    %137 = tpu.matmul %136, %5, %cst_45 {dimension_numbers = #tpu.dot_dimension_numbers<[1], [0], [0], [1], [0, 0, 1, 1], [], []>} : vector<8x128xbf16>, vector<128x512xbf16>, vector<8x512xf32> -> vector<8x512xf32>
    %138 = arith.addf %135, %137 : vector<8x512xf32>
    %139 = vector.extract_strided_slice %138 {offsets = [0, 0], sizes = [8, 384], strides = [1, 1]} : vector<8x512xf32> to vector<8x384xf32>
    %140 = arith.negf %139 : vector<8x384xf32>
    %141 = math.exp %140 : vector<8x384xf32>
    %cst_46 = arith.constant 1.000000e+00 : f32
    %142 = vector.broadcast %cst_46 : f32 to vector<8x384xf32>
    %143 = arith.addf %142, %141 : vector<8x384xf32>
    %144 = arith.divf %142, %143 : vector<8x384xf32>
    %145 = vector.extract_strided_slice %144 {offsets = [0, 0], sizes = [8, 128], strides = [1, 1]} : vector<8x384xf32> to vector<8x128xf32>
    %146 = vector.extract_strided_slice %144 {offsets = [0, 128], sizes = [8, 128], strides = [1, 1]} : vector<8x384xf32> to vector<8x128xf32>
    %147 = vector.extract_strided_slice %144 {offsets = [0, 256], sizes = [8, 128], strides = [1, 1]} : vector<8x384xf32> to vector<8x128xf32>
    %148 = vector.extract_strided_slice %138 {offsets = [0, 384], sizes = [8, 128], strides = [1, 1]} : vector<8x512xf32> to vector<8x128xf32>
    %149 = math.tanh %148 : vector<8x128xf32>
    %150 = arith.mulf %146, %126 : vector<8x128xf32>
    %151 = arith.mulf %145, %149 : vector<8x128xf32>
    %152 = arith.addf %150, %151 : vector<8x128xf32>
    %153 = math.tanh %152 : vector<8x128xf32>
    %154 = arith.mulf %147, %153 : vector<8x128xf32>
    %155 = vector.broadcast %131 : i32 to vector<8x128xi32>
    %156 = arith.cmpi sgt, %3, %155 : vector<8x128xi32>
    %cst_47 = arith.constant 0.000000e+00 : f32
    %157 = vector.broadcast %cst_47 : f32 to vector<8x128xf32>
    %158 = arith.select %156, %154, %157 : vector<8x128xi1>, vector<8x128xf32>
    %159 = arith.index_cast %130 : i32 to index
    %c0_48 = arith.constant 0 : index
    %c0_49 = arith.constant 0 : index
    %160 = vector.load %arg5[%159, %c0_48, %c0_49] : memref<8x8x128xf32, #tpu.memory_space<vmem>>, vector<1x8x128xf32>
    %161 = vector.shape_cast %160 : vector<1x8x128xf32> to vector<8x128xf32>
    %162 = vector.shape_cast %158 : vector<8x128xf32> to vector<1x8x128xf32>
    tpu.vector_store %arg5[%159, %c0_48, %c0_49], %162 {strides = array<i32>} : memref<8x8x128xf32, #tpu.memory_space<vmem>>, vector<1x8x128xf32>,
    %163 = arith.select %156, %154, %125 : vector<8x128xi1>, vector<8x128xf32>
    %164 = arith.select %156, %152, %126 : vector<8x128xi1>, vector<8x128xf32>
    %c4_i32 = arith.constant 4 : i32
    %c2_i32_50 = arith.constant 2 : i32
    %165 = arith.muli %c2_i32_50, %c4_i32 : i32
    %c7_i32_51 = arith.constant 7 : i32
    %166 = arith.subi %c7_i32_51, %165 : i32
    %167 = arith.muli %arg0, %166 : i32
    %168 = arith.addi %c4_i32, %167 : i32
    %169 = arith.addi %10, %168 : i32
    %c0_52 = arith.constant 0 : index
    %170 = arith.index_cast %168 : i32 to index
    %c0_53 = arith.constant 0 : index
    %c0_54 = arith.constant 0 : index
    %171 = vector.load %arg3[%c0_52, %170, %c0_53, %c0_54] : memref<1x8x8x512xbf16, #tpu.memory_space<vmem>>, vector<1x1x8x512xbf16>
    %172 = vector.shape_cast %171 : vector<1x1x8x512xbf16> to vector<8x512xbf16>
    %173 = arith.extf %172 : vector<8x512xbf16> to vector<8x512xf32>
    %174 = arith.truncf %163 : vector<8x128xf32> to vector<8x128xbf16>
    %cst_55 = arith.constant dense<0.000000e+00> : vector<8x512xf32>
    %175 = tpu.matmul %174, %5, %cst_55 {dimension_numbers = #tpu.dot_dimension_numbers<[1], [0], [0], [1], [0, 0, 1, 1], [], []>} : vector<8x128xbf16>, vector<128x512xbf16>, vector<8x512xf32> -> vector<8x512xf32>
    %176 = arith.addf %173, %175 : vector<8x512xf32>
    %177 = vector.extract_strided_slice %176 {offsets = [0, 0], sizes = [8, 384], strides = [1, 1]} : vector<8x512xf32> to vector<8x384xf32>
    %178 = arith.negf %177 : vector<8x384xf32>
    %179 = math.exp %178 : vector<8x384xf32>
    %cst_56 = arith.constant 1.000000e+00 : f32
    %180 = vector.broadcast %cst_56 : f32 to vector<8x384xf32>
    %181 = arith.addf %180, %179 : vector<8x384xf32>
    %182 = arith.divf %180, %181 : vector<8x384xf32>
    %183 = vector.extract_strided_slice %182 {offsets = [0, 0], sizes = [8, 128], strides = [1, 1]} : vector<8x384xf32> to vector<8x128xf32>
    %184 = vector.extract_strided_slice %182 {offsets = [0, 128], sizes = [8, 128], strides = [1, 1]} : vector<8x384xf32> to vector<8x128xf32>
    %185 = vector.extract_strided_slice %182 {offsets = [0, 256], sizes = [8, 128], strides = [1, 1]} : vector<8x384xf32> to vector<8x128xf32>
    %186 = vector.extract_strided_slice %176 {offsets = [0, 384], sizes = [8, 128], strides = [1, 1]} : vector<8x512xf32> to vector<8x128xf32>
    %187 = math.tanh %186 : vector<8x128xf32>
    %188 = arith.mulf %184, %164 : vector<8x128xf32>
    %189 = arith.mulf %183, %187 : vector<8x128xf32>
    %190 = arith.addf %188, %189 : vector<8x128xf32>
    %191 = math.tanh %190 : vector<8x128xf32>
    %192 = arith.mulf %185, %191 : vector<8x128xf32>
    %193 = vector.broadcast %169 : i32 to vector<8x128xi32>
    %194 = arith.cmpi sgt, %3, %193 : vector<8x128xi32>
    %cst_57 = arith.constant 0.000000e+00 : f32
    %195 = vector.broadcast %cst_57 : f32 to vector<8x128xf32>
    %196 = arith.select %194, %192, %195 : vector<8x128xi1>, vector<8x128xf32>
    %197 = arith.index_cast %168 : i32 to index
    %c0_58 = arith.constant 0 : index
    %c0_59 = arith.constant 0 : index
    %198 = vector.load %arg5[%197, %c0_58, %c0_59] : memref<8x8x128xf32, #tpu.memory_space<vmem>>, vector<1x8x128xf32>
    %199 = vector.shape_cast %198 : vector<1x8x128xf32> to vector<8x128xf32>
    %200 = vector.shape_cast %196 : vector<8x128xf32> to vector<1x8x128xf32>
    tpu.vector_store %arg5[%197, %c0_58, %c0_59], %200 {strides = array<i32>} : memref<8x8x128xf32, #tpu.memory_space<vmem>>, vector<1x8x128xf32>,
    %201 = arith.select %194, %192, %163 : vector<8x128xi1>, vector<8x128xf32>
    %202 = arith.select %194, %190, %164 : vector<8x128xi1>, vector<8x128xf32>
    %c5_i32 = arith.constant 5 : i32
    %c2_i32_60 = arith.constant 2 : i32
    %203 = arith.muli %c2_i32_60, %c5_i32 : i32
    %c7_i32_61 = arith.constant 7 : i32
    %204 = arith.subi %c7_i32_61, %203 : i32
    %205 = arith.muli %arg0, %204 : i32
    %206 = arith.addi %c5_i32, %205 : i32
    %207 = arith.addi %10, %206 : i32
    %c0_62 = arith.constant 0 : index
    %208 = arith.index_cast %206 : i32 to index
    %c0_63 = arith.constant 0 : index
    %c0_64 = arith.constant 0 : index
    %209 = vector.load %arg3[%c0_62, %208, %c0_63, %c0_64] : memref<1x8x8x512xbf16, #tpu.memory_space<vmem>>, vector<1x1x8x512xbf16>
    %210 = vector.shape_cast %209 : vector<1x1x8x512xbf16> to vector<8x512xbf16>
    %211 = arith.extf %210 : vector<8x512xbf16> to vector<8x512xf32>
    %212 = arith.truncf %201 : vector<8x128xf32> to vector<8x128xbf16>
    %cst_65 = arith.constant dense<0.000000e+00> : vector<8x512xf32>
    %213 = tpu.matmul %212, %5, %cst_65 {dimension_numbers = #tpu.dot_dimension_numbers<[1], [0], [0], [1], [0, 0, 1, 1], [], []>} : vector<8x128xbf16>, vector<128x512xbf16>, vector<8x512xf32> -> vector<8x512xf32>
    %214 = arith.addf %211, %213 : vector<8x512xf32>
    %215 = vector.extract_strided_slice %214 {offsets = [0, 0], sizes = [8, 384], strides = [1, 1]} : vector<8x512xf32> to vector<8x384xf32>
    %216 = arith.negf %215 : vector<8x384xf32>
    %217 = math.exp %216 : vector<8x384xf32>
    %cst_66 = arith.constant 1.000000e+00 : f32
    %218 = vector.broadcast %cst_66 : f32 to vector<8x384xf32>
    %219 = arith.addf %218, %217 : vector<8x384xf32>
    %220 = arith.divf %218, %219 : vector<8x384xf32>
    %221 = vector.extract_strided_slice %220 {offsets = [0, 0], sizes = [8, 128], strides = [1, 1]} : vector<8x384xf32> to vector<8x128xf32>
    %222 = vector.extract_strided_slice %220 {offsets = [0, 128], sizes = [8, 128], strides = [1, 1]} : vector<8x384xf32> to vector<8x128xf32>
    %223 = vector.extract_strided_slice %220 {offsets = [0, 256], sizes = [8, 128], strides = [1, 1]} : vector<8x384xf32> to vector<8x128xf32>
    %224 = vector.extract_strided_slice %214 {offsets = [0, 384], sizes = [8, 128], strides = [1, 1]} : vector<8x512xf32> to vector<8x128xf32>
    %225 = math.tanh %224 : vector<8x128xf32>
    %226 = arith.mulf %222, %202 : vector<8x128xf32>
    %227 = arith.mulf %221, %225 : vector<8x128xf32>
    %228 = arith.addf %226, %227 : vector<8x128xf32>
    %229 = math.tanh %228 : vector<8x128xf32>
    %230 = arith.mulf %223, %229 : vector<8x128xf32>
    %231 = vector.broadcast %207 : i32 to vector<8x128xi32>
    %232 = arith.cmpi sgt, %3, %231 : vector<8x128xi32>
    %cst_67 = arith.constant 0.000000e+00 : f32
    %233 = vector.broadcast %cst_67 : f32 to vector<8x128xf32>
    %234 = arith.select %232, %230, %233 : vector<8x128xi1>, vector<8x128xf32>
    %235 = arith.index_cast %206 : i32 to index
    %c0_68 = arith.constant 0 : index
    %c0_69 = arith.constant 0 : index
    %236 = vector.load %arg5[%235, %c0_68, %c0_69] : memref<8x8x128xf32, #tpu.memory_space<vmem>>, vector<1x8x128xf32>
    %237 = vector.shape_cast %236 : vector<1x8x128xf32> to vector<8x128xf32>
    %238 = vector.shape_cast %234 : vector<8x128xf32> to vector<1x8x128xf32>
    tpu.vector_store %arg5[%235, %c0_68, %c0_69], %238 {strides = array<i32>} : memref<8x8x128xf32, #tpu.memory_space<vmem>>, vector<1x8x128xf32>,
    %239 = arith.select %232, %230, %201 : vector<8x128xi1>, vector<8x128xf32>
    %240 = arith.select %232, %228, %202 : vector<8x128xi1>, vector<8x128xf32>
    %c6_i32 = arith.constant 6 : i32
    %c2_i32_70 = arith.constant 2 : i32
    %241 = arith.muli %c2_i32_70, %c6_i32 : i32
    %c7_i32_71 = arith.constant 7 : i32
    %242 = arith.subi %c7_i32_71, %241 : i32
    %243 = arith.muli %arg0, %242 : i32
    %244 = arith.addi %c6_i32, %243 : i32
    %245 = arith.addi %10, %244 : i32
    %c0_72 = arith.constant 0 : index
    %246 = arith.index_cast %244 : i32 to index
    %c0_73 = arith.constant 0 : index
    %c0_74 = arith.constant 0 : index
    %247 = vector.load %arg3[%c0_72, %246, %c0_73, %c0_74] : memref<1x8x8x512xbf16, #tpu.memory_space<vmem>>, vector<1x1x8x512xbf16>
    %248 = vector.shape_cast %247 : vector<1x1x8x512xbf16> to vector<8x512xbf16>
    %249 = arith.extf %248 : vector<8x512xbf16> to vector<8x512xf32>
    %250 = arith.truncf %239 : vector<8x128xf32> to vector<8x128xbf16>
    %cst_75 = arith.constant dense<0.000000e+00> : vector<8x512xf32>
    %251 = tpu.matmul %250, %5, %cst_75 {dimension_numbers = #tpu.dot_dimension_numbers<[1], [0], [0], [1], [0, 0, 1, 1], [], []>} : vector<8x128xbf16>, vector<128x512xbf16>, vector<8x512xf32> -> vector<8x512xf32>
    %252 = arith.addf %249, %251 : vector<8x512xf32>
    %253 = vector.extract_strided_slice %252 {offsets = [0, 0], sizes = [8, 384], strides = [1, 1]} : vector<8x512xf32> to vector<8x384xf32>
    %254 = arith.negf %253 : vector<8x384xf32>
    %255 = math.exp %254 : vector<8x384xf32>
    %cst_76 = arith.constant 1.000000e+00 : f32
    %256 = vector.broadcast %cst_76 : f32 to vector<8x384xf32>
    %257 = arith.addf %256, %255 : vector<8x384xf32>
    %258 = arith.divf %256, %257 : vector<8x384xf32>
    %259 = vector.extract_strided_slice %258 {offsets = [0, 0], sizes = [8, 128], strides = [1, 1]} : vector<8x384xf32> to vector<8x128xf32>
    %260 = vector.extract_strided_slice %258 {offsets = [0, 128], sizes = [8, 128], strides = [1, 1]} : vector<8x384xf32> to vector<8x128xf32>
    %261 = vector.extract_strided_slice %258 {offsets = [0, 256], sizes = [8, 128], strides = [1, 1]} : vector<8x384xf32> to vector<8x128xf32>
    %262 = vector.extract_strided_slice %252 {offsets = [0, 384], sizes = [8, 128], strides = [1, 1]} : vector<8x512xf32> to vector<8x128xf32>
    %263 = math.tanh %262 : vector<8x128xf32>
    %264 = arith.mulf %260, %240 : vector<8x128xf32>
    %265 = arith.mulf %259, %263 : vector<8x128xf32>
    %266 = arith.addf %264, %265 : vector<8x128xf32>
    %267 = math.tanh %266 : vector<8x128xf32>
    %268 = arith.mulf %261, %267 : vector<8x128xf32>
    %269 = vector.broadcast %245 : i32 to vector<8x128xi32>
    %270 = arith.cmpi sgt, %3, %269 : vector<8x128xi32>
    %cst_77 = arith.constant 0.000000e+00 : f32
    %271 = vector.broadcast %cst_77 : f32 to vector<8x128xf32>
    %272 = arith.select %270, %268, %271 : vector<8x128xi1>, vector<8x128xf32>
    %273 = arith.index_cast %244 : i32 to index
    %c0_78 = arith.constant 0 : index
    %c0_79 = arith.constant 0 : index
    %274 = vector.load %arg5[%273, %c0_78, %c0_79] : memref<8x8x128xf32, #tpu.memory_space<vmem>>, vector<1x8x128xf32>
    %275 = vector.shape_cast %274 : vector<1x8x128xf32> to vector<8x128xf32>
    %276 = vector.shape_cast %272 : vector<8x128xf32> to vector<1x8x128xf32>
    tpu.vector_store %arg5[%273, %c0_78, %c0_79], %276 {strides = array<i32>} : memref<8x8x128xf32, #tpu.memory_space<vmem>>, vector<1x8x128xf32>,
    %277 = arith.select %270, %268, %239 : vector<8x128xi1>, vector<8x128xf32>
    %278 = arith.select %270, %266, %240 : vector<8x128xi1>, vector<8x128xf32>
    %c7_i32_80 = arith.constant 7 : i32
    %c2_i32_81 = arith.constant 2 : i32
    %279 = arith.muli %c2_i32_81, %c7_i32_80 : i32
    %c7_i32_82 = arith.constant 7 : i32
    %280 = arith.subi %c7_i32_82, %279 : i32
    %281 = arith.muli %arg0, %280 : i32
    %282 = arith.addi %c7_i32_80, %281 : i32
    %283 = arith.addi %10, %282 : i32
    %c0_83 = arith.constant 0 : index
    %284 = arith.index_cast %282 : i32 to index
    %c0_84 = arith.constant 0 : index
    %c0_85 = arith.constant 0 : index
    %285 = vector.load %arg3[%c0_83, %284, %c0_84, %c0_85] : memref<1x8x8x512xbf16, #tpu.memory_space<vmem>>, vector<1x1x8x512xbf16>
    %286 = vector.shape_cast %285 : vector<1x1x8x512xbf16> to vector<8x512xbf16>
    %287 = arith.extf %286 : vector<8x512xbf16> to vector<8x512xf32>
    %288 = arith.truncf %277 : vector<8x128xf32> to vector<8x128xbf16>
    %cst_86 = arith.constant dense<0.000000e+00> : vector<8x512xf32>
    %289 = tpu.matmul %288, %5, %cst_86 {dimension_numbers = #tpu.dot_dimension_numbers<[1], [0], [0], [1], [0, 0, 1, 1], [], []>} : vector<8x128xbf16>, vector<128x512xbf16>, vector<8x512xf32> -> vector<8x512xf32>
    %290 = arith.addf %287, %289 : vector<8x512xf32>
    %291 = vector.extract_strided_slice %290 {offsets = [0, 0], sizes = [8, 384], strides = [1, 1]} : vector<8x512xf32> to vector<8x384xf32>
    %292 = arith.negf %291 : vector<8x384xf32>
    %293 = math.exp %292 : vector<8x384xf32>
    %cst_87 = arith.constant 1.000000e+00 : f32
    %294 = vector.broadcast %cst_87 : f32 to vector<8x384xf32>
    %295 = arith.addf %294, %293 : vector<8x384xf32>
    %296 = arith.divf %294, %295 : vector<8x384xf32>
    %297 = vector.extract_strided_slice %296 {offsets = [0, 0], sizes = [8, 128], strides = [1, 1]} : vector<8x384xf32> to vector<8x128xf32>
    %298 = vector.extract_strided_slice %296 {offsets = [0, 128], sizes = [8, 128], strides = [1, 1]} : vector<8x384xf32> to vector<8x128xf32>
    %299 = vector.extract_strided_slice %296 {offsets = [0, 256], sizes = [8, 128], strides = [1, 1]} : vector<8x384xf32> to vector<8x128xf32>
    %300 = vector.extract_strided_slice %290 {offsets = [0, 384], sizes = [8, 128], strides = [1, 1]} : vector<8x512xf32> to vector<8x128xf32>
    %301 = math.tanh %300 : vector<8x128xf32>
    %302 = arith.mulf %298, %278 : vector<8x128xf32>
    %303 = arith.mulf %297, %301 : vector<8x128xf32>
    %304 = arith.addf %302, %303 : vector<8x128xf32>
    %305 = math.tanh %304 : vector<8x128xf32>
    %306 = arith.mulf %299, %305 : vector<8x128xf32>
    %307 = vector.broadcast %283 : i32 to vector<8x128xi32>
    %308 = arith.cmpi sgt, %3, %307 : vector<8x128xi32>
    %cst_88 = arith.constant 0.000000e+00 : f32
    %309 = vector.broadcast %cst_88 : f32 to vector<8x128xf32>
    %310 = arith.select %308, %306, %309 : vector<8x128xi1>, vector<8x128xf32>
    %311 = arith.index_cast %282 : i32 to index
    %c0_89 = arith.constant 0 : index
    %c0_90 = arith.constant 0 : index
    %312 = vector.load %arg5[%311, %c0_89, %c0_90] : memref<8x8x128xf32, #tpu.memory_space<vmem>>, vector<1x8x128xf32>
    %313 = vector.shape_cast %312 : vector<1x8x128xf32> to vector<8x128xf32>
    %314 = vector.shape_cast %310 : vector<8x128xf32> to vector<1x8x128xf32>
    tpu.vector_store %arg5[%311, %c0_89, %c0_90], %314 {strides = array<i32>} : memref<8x8x128xf32, #tpu.memory_space<vmem>>, vector<1x8x128xf32>,
    %315 = arith.select %308, %306, %277 : vector<8x128xi1>, vector<8x128xf32>
    %316 = arith.select %308, %304, %278 : vector<8x128xi1>, vector<8x128xf32>
    %c8_i32_91 = arith.constant 8 : i32
    %c0_92 = arith.constant 0 : index
    %c0_93 = arith.constant 0 : index
    %317 = vector.load %arg8[%c0_92, %c0_93] : memref<8x128xf32, #tpu.memory_space<vmem>>, vector<8x128xf32>
    tpu.vector_store %arg8[%c0_92, %c0_93], %315 {strides = array<i32>} : memref<8x128xf32, #tpu.memory_space<vmem>>, vector<8x128xf32>,
    %c0_94 = arith.constant 0 : index
    %c0_95 = arith.constant 0 : index
    %318 = vector.load %arg9[%c0_94, %c0_95] : memref<8x128xf32, #tpu.memory_space<vmem>>, vector<8x128xf32>
    tpu.vector_store %arg9[%c0_94, %c0_95], %316 {strides = array<i32>} : memref<8x128xf32, #tpu.memory_space<vmem>>, vector<8x128xf32>,
    %c1_i32_96 = arith.constant 1 : i32
    %319 = arith.cmpi eq, %arg1, %c1_i32_96 : i32
    %320 = arith.extui %319 : i1 to i32
    %c0_i32_97 = arith.constant 0 : i32
    %321 = arith.cmpi ne, %320, %c0_i32_97 : i32
    scf.if %321 {
      %c0_98 = arith.constant 0 : index
      %c0_99 = arith.constant 0 : index
      %c0_100 = arith.constant 0 : index
      %322 = vector.load %arg6[%c0_98, %c0_99, %c0_100] : memref<1x8x128xf32, #tpu.memory_space<vmem>>, vector<1x8x128xf32>
      %323 = vector.shape_cast %322 : vector<1x8x128xf32> to vector<8x128xf32>
      %324 = vector.shape_cast %315 : vector<8x128xf32> to vector<1x8x128xf32>
      tpu.vector_store %arg6[%c0_98, %c0_99, %c0_100], %324 {strides = array<i32>} : memref<1x8x128xf32, #tpu.memory_space<vmem>>, vector<1x8x128xf32>,
      %c0_101 = arith.constant 0 : index
      %c0_102 = arith.constant 0 : index
      %c0_103 = arith.constant 0 : index
      %325 = vector.load %arg7[%c0_101, %c0_102, %c0_103] : memref<1x8x128xf32, #tpu.memory_space<vmem>>, vector<1x8x128xf32>
      %326 = vector.shape_cast %325 : vector<1x8x128xf32> to vector<8x128xf32>
      %327 = vector.shape_cast %316 : vector<8x128xf32> to vector<1x8x128xf32>
      tpu.vector_store %arg7[%c0_101, %c0_102, %c0_103], %327 {strides = array<i32>} : memref<1x8x128xf32, #tpu.memory_space<vmem>>, vector<1x8x128xf32>,
    } else {
    }
    return
  }
  func.func @transform_0(%arg0: i32, %arg1: i32) -> (i32, i32) {
    %c0_i32 = arith.constant 0 : i32
    %c0_i32_0 = arith.constant 0 : i32
    %c0_i32_1 = arith.constant 0 : i32
    return %c0_i32, %c0_i32_0 : i32, i32
  }
  func.func @transform_1(%arg0: i32, %arg1: i32) -> (i32, i32, i32, i32) {
    %c2_i32 = arith.constant 2 : i32
    %0 = arith.muli %c2_i32, %arg1 : i32
    %c1_i32 = arith.constant 1 : i32
    %1 = arith.subi %c1_i32, %0 : i32
    %2 = arith.muli %arg0, %1 : i32
    %3 = arith.addi %arg1, %2 : i32
    %c0_i32 = arith.constant 0 : i32
    %c0_i32_0 = arith.constant 0 : i32
    %c0_i32_1 = arith.constant 0 : i32
    return %arg0, %3, %c0_i32, %c0_i32_0 : i32, i32, i32, i32
  }
  func.func @transform_2(%arg0: i32, %arg1: i32) -> (i32, i32, i32) {
    %c0_i32 = arith.constant 0 : i32
    %c0_i32_0 = arith.constant 0 : i32
    %c0_i32_1 = arith.constant 0 : i32
    return %arg0, %c0_i32, %c0_i32_0 : i32, i32, i32
  }
  func.func @transform_3(%arg0: i32, %arg1: i32) -> (i32, i32, i32) {
    %c2_i32 = arith.constant 2 : i32
    %0 = arith.muli %c2_i32, %arg1 : i32
    %c1_i32 = arith.constant 1 : i32
    %1 = arith.subi %c1_i32, %0 : i32
    %2 = arith.muli %arg0, %1 : i32
    %3 = arith.addi %arg1, %2 : i32
    %c0_i32 = arith.constant 0 : i32
    %c0_i32_0 = arith.constant 0 : i32
    return %3, %c0_i32, %arg0 : i32, i32, i32
  }
  func.func @transform_4(%arg0: i32, %arg1: i32) -> (i32, i32, i32) {
    %c0_i32 = arith.constant 0 : i32
    %c0_i32_0 = arith.constant 0 : i32
    %c0_i32_1 = arith.constant 0 : i32
    return %arg0, %c0_i32, %c0_i32_0 : i32, i32, i32
  }
  func.func @transform_5(%arg0: i32, %arg1: i32) -> (i32, i32, i32) {
    %c0_i32 = arith.constant 0 : i32
    %c0_i32_0 = arith.constant 0 : i32
    %c0_i32_1 = arith.constant 0 : i32
    return %arg0, %c0_i32, %c0_i32_0 : i32, i32, i32
  }
}

</mosaic_0001>

<bundles_post_ra>
// kernel: tpu_custom_call.1
= control target key start
LH: loop header
LB: loop body
LE: loop exit
PB: predicated region body
PF: predicated region fallthrough
CT: control target
= control target key end

     0   :  { %s3749_s0 = inlined_call_operand.hbm [shape: s32[8,128], index: 0, kind: input, shape index: {}]   ;;  %s3750_s1 = inlined_call_operand.hbm [shape: bf16[2,16,8,512], index: 1, kind: input, shape index: {}]   ;;  %s3751_s2 = inlined_call_operand.hbm [shape: bf16[2,128,512], index: 2, kind: input, shape index: {}]   ;;  %s3752_s3 = inlined_call_operand.hbm [shape: f32[16,8,256], index: 3, kind: output, shape index: {0}]   ;;  %s3753_s4 = inlined_call_operand.hbm [shape: f32[2,8,128], index: 4, kind: output, shape index: {1}]   ;;  %s3754_s5 = inlined_call_operand.hbm [shape: f32[2,8,128], index: 5, kind: output, shape index: {2}]  }
   0x1   :  { %3780 = sst [smem:[#allocation28_spill]] %s3749_s0 }
   0x2   :  { %3781 = sst [smem:[#allocation29_spill]] %s3750_s1 }
   0x3   :  { %3782 = sst [smem:[#allocation30_spill]] %s3751_s2 }
   0x4   :  { %3783 = sst [smem:[#allocation31_spill]] %s3752_s3 }
   0x5   :  { %3784 = sst [smem:[#allocation32_spill]] %s3753_s4 }
   0x6   :  { %3785 = sst [smem:[#allocation33_spill]] %s3754_s5 }
   0x7   :  { %11 = vsyncpa [#allocation5], 0 }
   0x8   :  { %12 = vsyncpa [#allocation8], 0 }
   0x9   :  { %14 = vsyncpa [#allocation8 + $0x1], 0 }
   0xa   :  { %15 = vsyncpa [#allocation6], 0 }
   0xb   :  { %17 = vsyncpa [#allocation6 + $0x1], 0 }
   0xc   :  { %18 = vsyncpa [#allocation12], 0 }
   0xd   :  { %20 = vsyncpa [#allocation12 + $0x1], 0  ;;  %s2718_s18 = smov 0   ;;  %s2720_s19 = smov 0  }
   0xe   :  { %s2722_s20 = smov 0   ;;  %s2724_s21 = smov 0  }
   0xf   :  { %s2726_s22 = smov 0   ;;  %s2728_s23 = smov 0  }
  0x10   :  { %s2730_s24 = smov 0   ;;  %s2732_s25 = smov 0  }
  0x11   :  { %s2734_s26 = smov 0   ;;  %s2736_s27 = smov 0  }
  0x12   :  { %s2738_s28 = smov 0  }
  0x13 LB: > { %3786 = sst [smem:[#allocation19_spill]] %s2653_s23  ;;  %s35_s29 = sadd.s32 1, %s2665_s26  ;;  %s2673_s28 = sphi %s2738_s28, %s26_s28   ;;  %s2669_s27 = sphi %s2736_s27, %s3840_s27   ;;  %s2665_s26 = sphi %s2734_s26, %s3839_s26   ;;  %s2661_s25 = sphi %s2732_s25, %s3838_s25   ;;  %s2657_s24 = sphi %s2730_s24, %s3837_s24   ;;  %s2653_s23 = sphi %s2728_s23, %s3836_s23   ;;  %s2649_s22 = sphi %s2726_s22, %s3845_s22   ;;  %s2645_s21 = sphi %s2724_s21, %s3844_s21   ;;  %s2641_s20 = sphi %s2722_s20, %s3843_s20   ;;  %s2637_s19 = sphi %s2720_s19, %s3842_s19   ;;  %s2633_s18 = sphi %s2718_s18, %s3841_s18  }
  0x14   : > { %3787 = sst [smem:[#allocation20_spill]] %s2657_s24  ;;  %s38_s30 = sadd.s32 1, %s2669_s27 }
  0x15   : > { %3788 = sst [smem:[#allocation21_spill]] %s2661_s25  ;;  %p36_p0 = scmp.ge.s32.totalorder %s35_s29, 2 }
  0x16   : > { %3789 = sst [smem:[#allocation22_spill]] %s2665_s26  ;;  %s1916_s6 = sshll.u32 %s2665_s26, 1 }
  0x17   : > { %3790 = sst [smem:[#allocation23_spill]] %s2669_s27  ;;  %s64_s7 = ssub.s32 1, %s1916_s6 }
  0x18   : > { %s76_s8 = sadd.s32 1, %s2653_s23  ;;  %s3847_s29 = smov (%p36_p0, %s35_s29), 0 }
  0x19   : > { %3791 = sst [smem:[#allocation24_spill]] %s3847_s29  ;;  %s3849_s30 = smov (!%p36_p0, %s38_s30), %s2669_s27 }
  0x1a   : > { %s65_s9 = smul.u32 %s2669_s27, %s64_s7  ;;  %s1917_s10 = sshll.u32 %s3847_s29, 1 }
  0x1b   : > { %p40_p1 = scmp.ge.s32.totalorder %s3849_s30, 2  ;;  %s68_s11 = ssub.s32 1, %s1917_s10 }
  0x1c   : > { %s66_s12 = sadd.s32 %s2665_s26, %s65_s9  ;;  %p3765_p2 = scmp.ne.s32.totalorder %s2653_s23, %s2649_s22 }
  0x1d   : > { %s3851_s30 = smov (%p40_p1, %s3849_s30), 0  ;;  %p3766_p3 = scmp.eq.s32.totalorder %s2673_s28, 0 }
  0x1e   : > { %3792 = sst [smem:[#allocation25_spill]] %s3851_s30  ;;  %s69_s13 = smul.u32 %s68_s11, %s3851_s30 }
  0x1f   : > { %s2791_s14 = ssub.s32 %s2669_s27, %s3851_s30  ;;  %p2798_p4 = por %p3766_p3, %p3765_p2 }
  0x20   : > { %p100_p5 = scmp.eq.s32.totalorder %s2791_s14, 0  ;;  %s70_s16 = sadd.s32 %s69_s13, %s3847_s29 }
  0x21   : > { %p3764_p6 = scmp.lt.s32.totalorder %s2673_s28, 4  ;;  %s72_s17 = ssub.s32 %s66_s12, %s70_s16 }
  0x22   : > { %s238_s6 = sand.u32 1, %s2673_s28   ;;  %s73_s7 = sor.u32 %s72_s17, %s2791_s14 }
  0x23   : > { %p74_p7 = scmp.eq.s32.totalorder %s73_s7, 0  ;;  %s240_s9 = sand.u32 1, %s2653_s23  }
  0x24   : > { %s1923_s10 = sshll.u32 %s240_s9, 7  ;;  %s2046_s11 = sshll.u32 %s66_s12, 5 }
  0x25   : > { %s2809_s30 = scalar_select %p74_p7, %s2653_s23, %s76_s8  }
  0x26   : > { %s1927_s26 = sshll.u32 %s2669_s27, 6  ;;  %s242_s3 = scalar_lea.vmem [#allocation7], %s1923_s10 }
  0x27   : > { %3794 = sst [smem:[#allocation26_spill]] %s2809_s30  ;;  %s253_s5 = sadd.s32 %s2046_s11, %s1927_s26 }
  0x28   : > { %s256_s4 = sshll.u32 %s242_s3, 4  ;;  %s1928_s25 = sshll.u32 %s253_s5, 6  ;;  %s2812_s4 = int_to_ptr.vmem [resolvable:$true] %s256_s4 }
  0x29   : > { %s3795_s1 = sld [smem:[#allocation29_spill]]  ;;  %p2823_p8 = pnand %p3764_p6, %p2798_p4 }
  0x2a   : > { %s2827_s3 = scalar_lea.sflag [#allocation8], %s238_s6 }
  0x2b   : > { %p2397_p10 = pneg %p2823_p8 }
  0x2f   : > { %s2817_s24 = scalar_lea.hbm %s3795_s1, %s1928_s25  ;;  %s2400_s29 = scalar_lea.hbm %s3795_s1, 8192 }
  0x30   : > { %s2395_s5 = scalar_lea.hbm %s2817_s24, 2048  ;;  %p2401_p13 = scmp.lt.u32.totalorder %s2817_s24, %s3795_s1 }
  0x31   : > { %p2396_p9 = scmp.ne.s32.totalorder %s2817_s24, %s2395_s5  ;;  %p2402_p0 = scmp.lt.u32.totalorder %s2400_s29, %s2395_s5 }
  0x32   : > { %p2404_p4 = scmp.lt.u32.totalorder %s2395_s5, %s2817_s24 }
  0x33   : > { %p2398_p11 = pnand %p2397_p10, %p2396_p9  ;;  %p2403_p1 = por %p2402_p0, %p2401_p13 }
  0x35   : > { %p2399_p12 = pneg %p2398_p11  ;;  %p2405_p7 = por %p2404_p4, %p2403_p1 }
  0x37   : > { %p2406_p6 = pnand %p2405_p7, %p2399_p12 }
  0x39   : > { %2409 = shalt.err (!%p2406_p6)
}
  0x3a   : > { %s2410_s16 = scalar_lea.vmem %s2812_s4, 2048  ;;  %s2675_s17 = smov [#allocation7]  }
  0x3b   : > { %p2411_p9 = scmp.ne.s32.totalorder %s2812_s4, %s2410_s16  ;;  %s2415_s6 = sshll.u32 %s2675_s17, 4  ;;  %s2416_s6 = int_to_ptr.vmem [resolvable:$false] %s2415_s6 }
  0x3c   : > { %s2417_s7 = scalar_lea.vmem %s2416_s6, 4096  ;;  %p2418_p3 = scmp.lt.s32.totalorder %s2812_s4, %s2416_s6 }
  0x3d   : > { %p2413_p11 = pnand %p2411_p9, %p2397_p10  ;;  %p2419_p13 = scmp.lt.s32.totalorder %s2417_s7, %s2410_s16 }
  0x3f   : > { %p2414_p2 = pneg %p2413_p11  ;;  %p2420_p0 = por %p2419_p13, %p2418_p3 }
  0x41   : > { %p2421_p1 = pnand %p2420_p0, %p2414_p2 }
  0x43   : > { %2424 = shalt.err (!%p2421_p1)
}
  0x44   : > { %s3772_s9 = smov 256   ;;  %s3773_s10 = smov 16  }
  0x45   : > { %2072 = dma.hbm_to_vmem [thread:$0]  (!%p2823_p8), %s2817_s24, 2048, %s2812_s4, %s2827_s3, %s3772_s9, %s3772_s9, %s3773_s10  }
  0x46   : > { %s2859_s11 = sadd.s32 4294967295, %s2673_s28   ;;  %s3771_s13 = sadd.s32 4294967294, %s2673_s28  }
  0x47   : > { %p89_p2 = scmp.ne.s32.totalorder %s2649_s22, %s2645_s21  ;;  %p3767_p3 = scmp.eq.s32.totalorder %s2859_s11, 0 }
  0x48   : > { %s102_s5 = sadd.s32 1, %s2641_s20  ;;  %p109_p8 = scmp.ne.s32.totalorder %s2641_s20, %s2637_s19 }
  0x49   : > { %s2869_s25 = scalar_select %p100_p5, %s2641_s20, %s102_s5  }
  0x4a   : > { %p2873_p6 = por %p3767_p3, %p89_p2  ;;  %p115_p10 = scmp.ne.s32.totalorder %s2637_s19, %s2633_s18 }
  0x4b   : > { %3797 = sst [smem:[#allocation27_spill]] %s2869_s25  ;;  %p149_p12 = scmp.eq.s32.totalorder %s2859_s11, 3 }
  0x4c   : > { %s3798_s8 = scalar_select %p2873_p6, 1, 0 }
  0x4d   : > { %p3799_p4 = scmp.eq.s32.totalorder %s2673_s28, 0  ;;  %p155_p9 = scmp.eq.s32.totalorder %s3771_s13, 3 }
  0x4e   : > { %p2888_p11 = por %p115_p10, %p3767_p3  ;;  %p3801_p5 = scmp.ne.s32.totalorder %s2653_s23, %s2649_s22 }
  0x4f   : > { %p111_p7 = por %p109_p8, %p3799_p4  ;;  %p2899_p0 = por %p155_p9, %p89_p2 }
  0x50   : > { %s3800_s4 = scalar_select %p2888_p11, 1, 0 }
  0x51   : > { %p2895_p13 = por %p149_p12, %p3801_p5  ;;  %p2903_p1 = por %p149_p12, %p109_p8 }
  0x52   : > { %s3803_s18 = scalar_select %p2899_p0, 1, 0 }
  0x53   : > { %s3802_s24 = scalar_select %p2895_p13, 1, 0 }
  0x54   : > { %s3804_s14 = scalar_select %p2903_p1, 1, 0 }
  0x55   : > { %p2907_p4 = por %p155_p9, %p115_p10  ;;  %p1920_p3 = scmp.ge.s32.totalorder %s2673_s28, 1 }
  0x56   : > { %p214_p11 = scmp.lt.s32.totalorder %s2673_s28, 5  ;;  %p3806_p6 = scmp.lt.s32.totalorder %s2673_s28, 4 }
  0x57   : > { %s3805_s26 = scalar_select %p2907_p4, 1, 0 }
  0x58   : > { %p2915_p5 = pnand %p3806_p6, %p111_p7  ;;  %p2919_p13 = pnand %p1920_p3, %p214_p11 }
  0x59   : > { %s2678_s15 = smov [#allocation4]   ;;  %s268_s17 = sand.u32 1, %s2641_s20  }
  0x5a   : > { %s3807_s29 = scalar_select %p2915_p5, 1, 0 }
  0x5b   : > { %s3808_s12 = scalar_select %p2919_p13, 1, 0 }
  0x5c   : > { %s227_s16 = sshll.u32 %s2678_s15, 4  ;;  %p2065_p2 = pneg %p2919_p13  ;;  %s228_s16 = int_to_ptr.vmem [resolvable:$true] %s227_s16 }
  0x5d   : > { %s1929_s6 = sshll.u32 %s268_s17, 8  ;;  %s2047_s7 = sshll.u32 %s2669_s27, 12 }
  0x5e   : > { %p3809_p8 = scmp.eq.s32.totalorder %s2859_s11, 0  ;;  %s3811_s2 = sld [smem:[#allocation30_spill]] }
  0x5f   : > { %s270_s1 = scalar_lea.vmem [#allocation9], %s1929_s6  ;;  %s3812_s0 = sld [smem:[#allocation28_spill]] }
  0x60   : > { %p2929_p10 = pnand %p2065_p2, %p3809_p8  ;;  %s277_s30 = sshll.u32 %s270_s1, 4  ;;  %s2938_s30 = int_to_ptr.vmem [resolvable:$true] %s277_s30 }
  0x62   : > { %p2427_p6 = pneg %p2929_p10 }
  0x64   : > { %s2936_s10 = scalar_lea.hbm %s3811_s2, %s2047_s7 }
  0x65   : > { %s2425_s17 = scalar_lea.hbm %s3812_s0, 128 }
  0x66   : > { %p2426_p3 = scmp.ne.s32.totalorder %s3812_s0, %s2425_s17  ;;  %p2432_p9 = scmp.lt.u32.totalorder %s2425_s17, %s3812_s0 }
  0x68   : > { %p2428_p12 = pnand %p2427_p6, %p2426_p3 }
  0x6a   : > { %p2429_p7 = pneg %p2428_p12 }
  0x6c   : > { %p2434_p11 = pnand %p2432_p9, %p2429_p7 }
  0x6e   : > { %2437 = shalt.err (!%p2434_p11)
}
  0x6f   : > { %s2438_s1 = scalar_lea.vmem %s228_s16, 128  ;;  %p2446_p0 = scmp.lt.s32.totalorder %s228_s16, %s228_s16 }
  0x70   : > { %p2439_p2 = scmp.ne.s32.totalorder %s228_s16, %s2438_s1  ;;  %p2447_p1 = scmp.lt.s32.totalorder %s2438_s1, %s2438_s1 }
  0x72   : > { %p2441_p8 = pnand %p2439_p2, %p2427_p6  ;;  %p2448_p13 = por %p2447_p1, %p2446_p0 }
  0x74   : > { %p2442_p4 = pneg %p2441_p8 }
  0x76   : > { %p2449_p5 = pnand %p2448_p13, %p2442_p4 }
  0x78   : > { %2452 = shalt.err (!%p2449_p5)
}
  0x79   : > { %2068 = dma.hbm_to_vmem [thread:$0]  (!%p2929_p10), %s3812_s0, 128, %s228_s16, [#allocation5]  }
  0x7a   : > { %s2453_s25 = scalar_lea.hbm %s2936_s10, 4096  ;;  %p3813_p6 = scmp.ne.s32.totalorder %s3807_s29, 0 }
  0x7b   : > { %p2454_p3 = scmp.ne.s32.totalorder %s2936_s10, %s2453_s25  ;;  %s2458_s5 = scalar_lea.hbm %s3811_s2, 8192 }
  0x7c   : > { %p2455_p12 = pneg %p3813_p6  ;;  %p2459_p1 = scmp.lt.u32.totalorder %s2936_s10, %s3811_s2 }
  0x7d   : > { %p2460_p4 = scmp.lt.u32.totalorder %s2458_s5, %s2453_s25  ;;  %p2462_p7 = scmp.lt.u32.totalorder %s2453_s25, %s2936_s10 }
  0x7e   : > { %p2456_p13 = pnand %p2455_p12, %p2454_p3 }
  0x7f   : > { %p2461_p5 = por %p2460_p4, %p2459_p1 }
  0x80   : > { %p2457_p0 = pneg %p2456_p13 }
  0x81   : > { %p2463_p10 = por %p2462_p7, %p2461_p5 }
  0x83   : > { %p2464_p9 = pnand %p2463_p10, %p2457_p0 }
  0x85   : > { %2467 = shalt.err (!%p2464_p9)
}
  0x86   : > { %s2468_s16 = scalar_lea.vmem %s2938_s30, 4096  ;;  %s2679_s9 = smov [#allocation9]  }
  0x87   : > { %p2469_p11 = scmp.ne.s32.totalorder %s2938_s30, %s2468_s16  ;;  %s2473_s13 = sshll.u32 %s2679_s9, 4  ;;  %s2474_s13 = int_to_ptr.vmem [resolvable:$false] %s2473_s13 }
  0x88   : > { %s2475_s1 = scalar_lea.vmem %s2474_s13, 8192  ;;  %p2476_p3 = scmp.lt.s32.totalorder %s2938_s30, %s2474_s13 }
  0x89   : > { %p2471_p2 = pnand %p2469_p11, %p2455_p12  ;;  %p2477_p13 = scmp.lt.s32.totalorder %s2475_s1, %s2468_s16 }
  0x8b   : > { %p2472_p8 = pneg %p2471_p2  ;;  %p2478_p1 = por %p2477_p13, %p2476_p3 }
  0x8d   : > { %p2479_p4 = pnand %p2478_p1, %p2472_p8 }
  0x8f   : > { %2482 = shalt.err (!%p2479_p4)
}
  0x90   : > { %s3814_s23 = smov 16   ;;  %s3815_s27 = smov 256  }
  0x91   : > { %2075 = dma.hbm_to_vmem [thread:$0]  (!%p3813_p6), %s2936_s10, 4096, %s2938_s30, %s2827_s3, %s3815_s27, %s3815_s27, %s3814_s23  }
  0x92   : > { %p3816_p12 = scmp.ne.s32.totalorder %s3808_s12, 0 }
  0x93   : > { %p3817_p0 = scmp.eq.s32.totalorder (!%p3816_p12), %s2859_s11, 0 }
  0x94   : > { %289 = sbr.rel (%p3816_p12) target bundleno = 2384 (0x950), region = 32 }
  0x9b   : > { %2612 = dma.done.wait (%p3817_p0), [#allocation5], 128   ;;  %p3818_p5 = pmov %p3817_p0 }
  0x9c   : > { %s295_s29 = sand.u32 1, %s2859_s11   ;;  %s2993_s25 = sand.u32 1, %s2649_s22  }
  0x9d   : > { %2614 = vsyncadd (%p3818_p5), [#allocation5], 4294967168  ;;  %s1934_s6 = sshll.u32 %s2993_s25, 7  ;;  %s296_s30 = scalar_lea.sflag [#allocation8], %s295_s29 }
  0x9e   : > { %s2998_s3 = scalar_lea.vmem [#allocation7], %s1934_s6  ;;  %p3819_p6 = scmp.ne.s32.totalorder %s3798_s8, 0 }
  0xa0   : > { %2616 = dma.done.wait (%p3819_p6), %s296_s30, 2048  }
  0xa1   : > { %2618 = vsyncadd (%p3819_p6), %s296_s30, 4294965248  ;;  %s306_s10 = sand.u32 1, %s2637_s19   ;;  %p3820_p7 = scmp.ne.s32.totalorder %s3800_s4, 0 }
  0xa2   : > { %s1935_s12 = sshll.u32 %s306_s10, 8 }
  0xa3   : > { %s3005_s7 = scalar_lea.vmem [#allocation9], %s1935_s12 }
  0xa4   : > { %2620 = dma.done.wait (%p3820_p7), %s296_s30, 4096  }
  0xa5   : > { %2622 = vsyncadd (%p3820_p7), %s296_s30, 4294963200  ;;  %s1936_s5 = sshll.u32 %s2993_s25, 6  ;;  %s3012_s15 = sshll.u32 %s306_s10, 3 }
  0xa6   : > { %s3014_s17 = scalar_lea.vmem [#allocation10], %s1936_s5  ;;  %s342_s8 = scalar_lea.vmem [#allocation11], %s3012_s15 }
  0xa7   : > { %s3779_s16 = scalar_lea.vmem [#allocation13], %s3012_s15  ;;  %s3821_s9 = sld [smem:[#allocation20_spill]] }
  0xad   : > { %p1939_p10 = scmp.ne.s32.totalorder %s3821_s9, 0 }
  0xae   : > { %v2680_v0 = vmov (!%p1939_p10), 0.0  }
  0xaf   : > { %364 = sbr.rel (%p1939_p10) target bundleno = 182 (0xb6), region = 48  ;;  %365 = vst [vmem:[#allocation2] sm:$0xff] (!%p1939_p10), %v2680_v0  ;;  %366 = vst [vmem:[#allocation3] sm:$0xff] (!%p1939_p10), %v2680_v0 }
  0xb6 PF: > { %v3020_v1 = vld [vmem:[%s3005_s7 + $0x4] ss:$16 sps:$4 sm:$0xff]   ;;  %v3023_v2 = vld [vmem:[%s3005_s7] ss:$16 sps:$4 sm:$0xff]   ;;  %v2681_v3 = vmov 0   ;;  %v3133_v31 = vld [vmem:[#allocation2] sm:$0xff] }
  0xb7   : > { %611 = vmatprep.mubr.bf16.mxu0 %v2681_v3  ;;  %652 = vmatprep.mubr.bf16.mxu1 %v2681_v3  ;;  %v3029_v4 = vld [vmem:[%s3005_s7 + $0x24] ss:$16 sps:$4 sm:$0xff]   ;;  %v3033_v5 = vld [vmem:[%s3005_s7 + $0x20] ss:$16 sps:$4 sm:$0xff]   ;;  %v3040_v7 = vld [vmem:[%s3005_s7 + $0xc] ss:$16 sps:$4 sm:$0xff]   ;;  %v418_v34 = vpack.c.bf16 %v3133_v31, %v3133_v31 }
  0xb8   : > { %579 = vmatprep.subr.bf16.mxu0 %v3020_v1  ;;  %v3037_v6 = vld [vmem:[%s3005_s7 + $0x44] ss:$16 sps:$4 sm:$0xff]   ;;  %v3043_v8 = vld [vmem:[%s3005_s7 + $0x8] ss:$16 sps:$4 sm:$0xff]   ;;  %v3047_v9 = vld [vmem:[%s3005_s7 + $0x40] ss:$16 sps:$4 sm:$0xff]   ;;  %620 = vmatprep.subr.bf16.mxu1 %v3040_v7 }
  0xb9   : > { %580 = vmatpush1.bf16.msra.mxu0 %v3023_v2  ;;  %v3052_v10 = vld [vmem:[%s3005_s7 + $0x64] ss:$16 sps:$4 sm:$0xff]   ;;  %621 = vmatpush1.bf16.msra.mxu1 %v3043_v8  ;;  %v3056_v11 = vld [vmem:[%s3005_s7 + $0x2c] ss:$16 sps:$4 sm:$0xff]   ;;  %v3059_v12 = vld [vmem:[%s3005_s7 + $0x28] ss:$16 sps:$4 sm:$0xff]  }
  0xba   : > { %581 = vmatprep.subr.bf16.mxu0 %v3029_v4  ;;  %622 = vmatprep.subr.bf16.mxu1 %v3056_v11  ;;  %v3064_v13 = vld [vmem:[%s3005_s7 + $0x60] ss:$16 sps:$4 sm:$0xff]   ;;  %v3067_v14 = vld [vmem:[%s3005_s7 + $0x84] ss:$16 sps:$4 sm:$0xff]   ;;  %v3070_v15 = vld [vmem:[%s3005_s7 + $0x4c] ss:$16 sps:$4 sm:$0xff]  }
  0xbb   : > { %v3075_v16 = vld [vmem:[%s3005_s7 + $0x48] ss:$16 sps:$4 sm:$0xff]   ;;  %v3079_v17 = vld [vmem:[%s3005_s7 + $0x6c] ss:$16 sps:$4 sm:$0xff]   ;;  %v3083_v18 = vld [vmem:[%s3005_s7 + $0x80] ss:$16 sps:$4 sm:$0xff]  }
  0xbc   : > { %v3087_v19 = vld [vmem:[%s3005_s7 + $0xa4] ss:$16 sps:$4 sm:$0xff]   ;;  %v3091_v20 = vld [vmem:[%s3005_s7 + $0x68] ss:$16 sps:$4 sm:$0xff]   ;;  %v3095_v21 = vld [vmem:[%s3005_s7 + $0x8c] ss:$16 sps:$4 sm:$0xff]  }
  0xbd   : > { %582 = vmatpush1.bf16.msra.mxu0 %v3033_v5  ;;  %623 = vmatpush1.bf16.msra.mxu1 %v3059_v12  ;;  %v3098_v22 = vld [vmem:[%s3005_s7 + $0xa0] ss:$16 sps:$4 sm:$0xff]   ;;  %v3102_v23 = vld [vmem:[%s3005_s7 + $0xc4] ss:$16 sps:$4 sm:$0xff]   ;;  %v3107_v24 = vld [vmem:[%s3005_s7 + $0x88] ss:$16 sps:$4 sm:$0xff]  }
  0xbe   : > { %583 = vmatprep.subr.bf16.mxu0 %v3037_v6  ;;  %624 = vmatprep.subr.bf16.mxu1 %v3070_v15  ;;  %v3111_v25 = vld [vmem:[%s3005_s7 + $0xac] ss:$16 sps:$4 sm:$0xff]   ;;  %v3115_v26 = vld [vmem:[%s3005_s7 + $0xc0] ss:$16 sps:$4 sm:$0xff]   ;;  %v3119_v27 = vld [vmem:[%s3005_s7 + $0xe4] ss:$16 sps:$4 sm:$0xff]  }
  0xbf   : > { %v3123_v28 = vld [vmem:[%s3005_s7 + $0xa8] ss:$16 sps:$4 sm:$0xff]   ;;  %v3127_v29 = vld [vmem:[%s3005_s7 + $0xcc] ss:$16 sps:$4 sm:$0xff]   ;;  %v3131_v30 = vld [vmem:[%s3005_s7 + $0xe0] ss:$16 sps:$4 sm:$0xff]  }
  0xc0   : > { %v3138_v32 = vld [vmem:[%s3005_s7 + $0xc8] ss:$16 sps:$4 sm:$0xff]   ;;  %v3142_v33 = vld [vmem:[%s3005_s7 + $0xec] ss:$16 sps:$4 sm:$0xff]   ;;  %s3822_s4 = sld [smem:[#allocation21_spill]]  ;;  %s3823_s23 = sld [smem:[#allocation20_spill]] }
  0xc1   : > { %584 = vmatpush1.bf16.msra.mxu0 %v3047_v9  ;;  %625 = vmatpush1.bf16.msra.mxu1 %v3075_v16  ;;  %v3149_v35 = vld [vmem:[%s3005_s7 + $0xe8] ss:$16 sps:$4 sm:$0xff]   ;;  %v406_v63 = vld [vmem:[#allocation3] sm:$0xff] }
  0xc2   : > { %585 = vmatprep.subr.bf16.mxu0 %v3052_v10  ;;  %626 = vmatprep.subr.bf16.mxu1 %v3079_v17 }
  0xc5   : > { %586 = vmatpush1.bf16.msra.mxu0 %v3064_v13  ;;  %627 = vmatpush1.bf16.msra.mxu1 %v3091_v20 }
  0xc6   : > { %587 = vmatprep.subr.bf16.mxu0 %v3067_v14  ;;  %628 = vmatprep.subr.bf16.mxu1 %v3095_v21  ;;  %s2048_s13 = smul.u32 112, %s3822_s4  ;;  %s1940_s27 = sshll.u32 %s3823_s23, 1 }
  0xc7   : > { %s401_s6 = ssub.s32 1, %s1940_s27  ;;  %s407_s12 = smul.u32 7, %s3822_s4 }
  0xc8   : > { %s411_s1 = scalar_lea.vmem %s2998_s3, %s2048_s13 [#allocation7]  ;;  %s402_s30 = smul.u32 %s3822_s4, %s401_s6 }
  0xc9   : > { %588 = vmatpush1.bf16.msra.mxu0 %v3083_v18  ;;  %629 = vmatpush1.bf16.msra.mxu1 %v3107_v24  ;;  %v412_v36 = vld [vmem:[%s411_s1] sm:$0xff]  ;;  %v413_v40 = vld [vmem:[%s411_s1 + $0x8] sm:$0xff]  ;;  %s1979_s13 = smul.u32 56, %s3822_s4  ;;  %p2034_p9 = scmp.ne.s32.totalorder %s3823_s23, 1 }
  0xca   : > { %589 = vmatprep.subr.bf16.mxu0 %v3087_v19  ;;  %630 = vmatprep.subr.bf16.mxu1 %v3111_v25  ;;  %v414_v37 = vunpack.c.l.bf16 %v412_v36  ;;  %v415_v38 = vunpack.c.h.bf16 %v412_v36  ;;  %v416_v47 = vunpack.c.l.bf16 %v413_v40  ;;  %v417_v53 = vunpack.c.h.bf16 %v413_v40  ;;  %s3194_s10 = sadd.s32 %s3823_s23, %s402_s30  ;;  %v3201_v36 = vld [vmem:[#allocation4] sm:$0xff]  ;;  %s1980_s27 = smul.u32 80, %s3822_s4 }
  0xcb   : > { %s3198_s5 = sshll.u32 %s3194_s10, 3  ;;  %s693_s1 = scalar_lea.vmem %s3014_s17, %s1979_s13 [#allocation10] }
  0xcc   : > { %s408_s9 = sadd.s32 %s3198_s5, %s407_s12  ;;  %s1768_s6 = scalar_lea.vmem %s2998_s3, %s1980_s27 [#allocation7] }
  0xcd   : > { %590 = vmatpush1.bf16.msra.mxu0 %v3098_v22  ;;  %631 = vmatpush1.bf16.msra.mxu1 %v3123_v28  ;;  %s697_s30 = smul.u32 5, %s3822_s4 }
  0xce   : > { %591 = vmatprep.subr.bf16.mxu0 %v3102_v23  ;;  %632 = vmatprep.subr.bf16.mxu1 %v3127_v29  ;;  %s1986_s13 = smul.u32 40, %s3822_s4 }
  0xcf   : > { %s698_s12 = sadd.s32 1, %s697_s30  ;;  %s1988_s27 = smul.u32 48, %s3822_s4 }
  0xd0   : > { %s828_s30 = smul.u32 3, %s3822_s4 }
  0xd1   : > { %592 = vmatpush1.bf16.msra.mxu0 %v3115_v26  ;;  %633 = vmatpush1.bf16.msra.mxu1 %v3138_v32 }
  0xd2   : > { %593 = vmatprep.subr.bf16.mxu0 %v3119_v27  ;;  %634 = vmatprep.subr.bf16.mxu1 %v3142_v33 }
  0xd5   : > { %594 = vmatpush1.bf16.msra.mxu0 %v3131_v30  ;;  %635 = vmatpush1.bf16.msra.mxu1 %v3149_v35 }
  0xd6   : > { %710 = vmatprep.subr.bf16.mxu0 %v3020_v1  ;;  %751 = vmatprep.subr.bf16.mxu1 %v3040_v7 }
  0xd8   : > { %612 = vmatmul.mubr.bf16.vlgmr.msra.gmra.mrb[0].mxu0 %v418_v34  ;;  %653 = vmatmul.mubr.bf16.vlgmr.msra.gmra.mrb[0].mxu1 %v418_v34 }
  0xd9   : > { %711 = vmatpush1.bf16.msra.mxu0 %v3023_v2  ;;  %742 = vmatprep.mubr.bf16.mxu0 %v2681_v3 }
  0xda   : > { %712 = vmatprep.subr.bf16.mxu0 %v3029_v4  ;;  %752 = vmatpush1.bf16.msra.mxu1 %v3043_v8 }
  0xdb   : > { %753 = vmatprep.subr.bf16.mxu1 %v3056_v11  ;;  %783 = vmatprep.mubr.bf16.mxu1 %v2681_v3 }
  0xdd   : > { %713 = vmatpush1.bf16.msra.mxu0 %v3033_v5 }
  0xde   : > { %714 = vmatprep.subr.bf16.mxu0 %v3037_v6  ;;  %754 = vmatpush1.bf16.msra.mxu1 %v3059_v12 }
  0xdf   : > { %755 = vmatprep.subr.bf16.mxu1 %v3070_v15 }
  0xe1   : > { %715 = vmatpush1.bf16.msra.mxu0 %v3047_v9 }
  0xe2   : > { %716 = vmatprep.subr.bf16.mxu0 %v3052_v10  ;;  %756 = vmatpush1.bf16.msra.mxu1 %v3075_v16 }
  0xe3   : > { %757 = vmatprep.subr.bf16.mxu1 %v3079_v17 }
  0xe5   : > { %717 = vmatpush1.bf16.msra.mxu0 %v3064_v13 }
  0xe6   : > { %718 = vmatprep.subr.bf16.mxu0 %v3067_v14  ;;  %758 = vmatpush1.bf16.msra.mxu1 %v3091_v20 }
  0xe7   : > { %759 = vmatprep.subr.bf16.mxu1 %v3095_v21 }
  0xe9   : > { %719 = vmatpush1.bf16.msra.mxu0 %v3083_v18 }
  0xea   : > { %720 = vmatprep.subr.bf16.mxu0 %v3087_v19  ;;  %760 = vmatpush1.bf16.msra.mxu1 %v3107_v24 }
  0xeb   : > { %761 = vmatprep.subr.bf16.mxu1 %v3111_v25 }
  0xed   : > { %721 = vmatpush1.bf16.msra.mxu0 %v3098_v22 }
  0xee   : > { %722 = vmatprep.subr.bf16.mxu0 %v3102_v23  ;;  %762 = vmatpush1.bf16.msra.mxu1 %v3123_v28 }
  0xef   : > { %763 = vmatprep.subr.bf16.mxu1 %v3127_v29 }
  0xf1   : > { %723 = vmatpush1.bf16.msra.mxu0 %v3115_v26 }
  0xf2   : > { %724 = vmatprep.subr.bf16.mxu0 %v3119_v27  ;;  %764 = vmatpush1.bf16.msra.mxu1 %v3138_v32 }
  0xf3   : > { %765 = vmatprep.subr.bf16.mxu1 %v3142_v33 }
  0xf5   : > { %725 = vmatpush1.bf16.msra.mxu0 %v3131_v30 }
  0xf6   : > { %841 = vmatprep.subr.bf16.mxu0 %v3020_v1  ;;  %766 = vmatpush1.bf16.msra.mxu1 %v3149_v35 }
  0xf7   : > { %882 = vmatprep.subr.bf16.mxu1 %v3040_v7 }
 0x1ab   : > { %v613_v39 = vpop.f32.mrb[0].mxu0  ;;  %v654_v49 = vpop.f32.mrb[0].mxu1 }
 0x1ac   : > { %v661_v41 = vadd.f32 %v613_v39, %v414_v37  ;;  %v615_v42 = vpop.f32.mrb[1].mxu0  ;;  %v656_v50 = vpop.f32.mrb[1].mxu1  ;;  %v663_v51 = vadd.f32 %v654_v49, %v416_v47  ;;  %v689_v37 = vstv %s408_s9  ;;  %s699_s9 = sadd.s32 %s3198_s5, %s698_s12  ;;  %s829_s12 = sadd.s32 2, %s828_s30 }
 0x1ad   : > { %v662_v43 = vadd.f32 %v615_v42, %v415_v38  ;;  %v617_v44 = vpop.f32.mrb[2].mxu0  ;;  %v658_v52 = vpop.f32.mrb[2].mxu1  ;;  %v664_v56 = vadd.f32 %v656_v50, %v417_v53  ;;  %vm690_vm0 = vcmp.gt.s32.totalorder %v3201_v36, %v689_v37  ;;  %s959_s30 = sadd.s32 3, %s3822_s4 }
 0x1ae   : > { %v1976_v45 = vmul.f32 -1.442695, %v661_v41  ;;  %v618_v46 = vpop.f32.mrb[3].mxu0  ;;  %v659_v54 = vpop.f32.mrb[3].mxu1  ;;  %v1978_v55 = vmul.f32 -1.442695, %v663_v51 }
 0x1af   : > { %v1977_v48 = vmul.f32 -1.442695, %v662_v43 }
 0x1b0   : > { %2234 = vpow2.f32 %v1976_v45 }
 0x1b1   : > { %2236 = vpow2.f32 %v1977_v48 }
 0x1b2   : > { %2238 = vpow2.f32 %v1978_v55 }
 0x1b3   : > { %2240 = vtanh.f32 %v664_v56  ;;  %v1982_v56 = vld [vmem:[%s1768_s6 + $0x18] sm:$0xff] }
 0x1ba   : > { %v2235_v57 = vpop.eup %2234 }
 0x1bb   : > { %v2237_v58 = vpop.eup %2236  ;;  %v674_v59 = vadd.f32 1.0, %v2235_v57 }
 0x1bc   : > { %v675_v60 = vadd.f32 1.0, %v2237_v58  ;;  %v2239_v61 = vpop.eup %2238 }
 0x1bd   : > { %2242 = vrcp.f32 %v674_v59  ;;  %v2241_v62 = vpop.eup %2240  ;;  %v676_v34 = vadd.f32 1.0, %v2239_v61 }
 0x1be   : > { %2244 = vrcp.f32 %v675_v60 }
 0x1bf   : > { %2246 = vrcp.f32 %v676_v34  ;;  %v708_v34 = vunpack.c.h.bf16 %v1982_v56 }
 0x1c7   : > { %v2243_v0 = vpop.eup %2242 }
 0x1c8   : > { %v2245_v38 = vpop.eup %2244  ;;  %v685_v39 = vmul.f32 %v2243_v0, %v2241_v62  ;;  %v707_v0 = vunpack.c.l.bf16 %v1982_v56 }
 0x1c9   : > { %v684_v40 = vmul.f32 %v2245_v38, %v406_v63  ;;  %v2247_v43 = vpop.eup %2246 }
 0x1cb   : > { %v686_v41 = vadd.f32 %v685_v39, %v684_v40 }
 0x1cd   : > { %2248 = vtanh.f32 %v686_v41  ;;  %v3204_v42 = vsel %vm690_vm0, %v686_v41, %v406_v63 }
 0x1d7   : > { %v2249_v44 = vpop.eup %2248 }
 0x1d8   : > { %v688_v45 = vmul.f32 %v2249_v44, %v2247_v43 }
 0x1da   : > { %v691_v46 = vsel %vm690_vm0, %v688_v45, 0.0  ;;  %v3209_v47 = vsel %vm690_vm0, %v688_v45, %v3133_v31  ;;  %v1981_v31 = vld [vmem:[%s1768_s6 + $0x10] sm:$0xff]  ;;  %s1776_s6 = scalar_lea.vmem %s2998_s3, %s1988_s27 [#allocation7]  ;;  %s1996_s27 = sshll.u32 %s3822_s4, 4 }
 0x1db   : > { %694 = vst [vmem:[%s693_s1] sm:$0xff] %v691_v46  ;;  %v709_v48 = vpack.c.bf16 %v3209_v47, %v3209_v47  ;;  %v705_v49 = vunpack.c.l.bf16 %v1981_v31  ;;  %v706_v50 = vunpack.c.h.bf16 %v1981_v31  ;;  %s1772_s1 = scalar_lea.vmem %s3014_s17, %s1986_s13 [#allocation10]  ;;  %s1994_s13 = smul.u32 24, %s3822_s4 }
 0x1dd   : > { %743 = vmatmul.mubr.bf16.vlgmr.msra.gmra.mrb[4].mxu0 %v709_v48  ;;  %784 = vmatmul.mubr.bf16.vlgmr.msra.gmra.mrb[4].mxu1 %v709_v48 }
 0x1de   : > { %842 = vmatpush1.bf16.msra.mxu0 %v3023_v2  ;;  %883 = vmatpush1.bf16.msra.mxu1 %v3043_v8 }
 0x1df   : > { %843 = vmatprep.subr.bf16.mxu0 %v3029_v4  ;;  %884 = vmatprep.subr.bf16.mxu1 %v3056_v11 }
 0x1e0   : > { %873 = vmatprep.mubr.bf16.mxu0 %v2681_v3  ;;  %914 = vmatprep.mubr.bf16.mxu1 %v2681_v3 }
 0x1e2   : > { %844 = vmatpush1.bf16.msra.mxu0 %v3033_v5  ;;  %885 = vmatpush1.bf16.msra.mxu1 %v3059_v12 }
 0x1e3   : > { %845 = vmatprep.subr.bf16.mxu0 %v3037_v6  ;;  %886 = vmatprep.subr.bf16.mxu1 %v3070_v15 }
 0x1e6   : > { %846 = vmatpush1.bf16.msra.mxu0 %v3047_v9  ;;  %887 = vmatpush1.bf16.msra.mxu1 %v3075_v16 }
 0x1e7   : > { %847 = vmatprep.subr.bf16.mxu0 %v3052_v10  ;;  %888 = vmatprep.subr.bf16.mxu1 %v3079_v17 }
 0x1ea   : > { %848 = vmatpush1.bf16.msra.mxu0 %v3064_v13  ;;  %889 = vmatpush1.bf16.msra.mxu1 %v3091_v20 }
 0x1eb   : > { %849 = vmatprep.subr.bf16.mxu0 %v3067_v14  ;;  %890 = vmatprep.subr.bf16.mxu1 %v3095_v21 }
 0x1ee   : > { %850 = vmatpush1.bf16.msra.mxu0 %v3083_v18  ;;  %891 = vmatpush1.bf16.msra.mxu1 %v3107_v24 }
 0x1ef   : > { %851 = vmatprep.subr.bf16.mxu0 %v3087_v19  ;;  %892 = vmatprep.subr.bf16.mxu1 %v3111_v25 }
 0x1f2   : > { %852 = vmatpush1.bf16.msra.mxu0 %v3098_v22  ;;  %893 = vmatpush1.bf16.msra.mxu1 %v3123_v28 }
 0x1f3   : > { %853 = vmatprep.subr.bf16.mxu0 %v3102_v23  ;;  %894 = vmatprep.subr.bf16.mxu1 %v3127_v29 }
 0x1f6   : > { %854 = vmatpush1.bf16.msra.mxu0 %v3115_v26  ;;  %895 = vmatpush1.bf16.msra.mxu1 %v3138_v32 }
 0x1f7   : > { %855 = vmatprep.subr.bf16.mxu0 %v3119_v27  ;;  %896 = vmatprep.subr.bf16.mxu1 %v3142_v33 }
 0x1fa   : > { %856 = vmatpush1.bf16.msra.mxu0 %v3131_v30  ;;  %897 = vmatpush1.bf16.msra.mxu1 %v3149_v35 }
 0x1fb   : > { %971 = vmatprep.subr.bf16.mxu0 %v3020_v1  ;;  %1012 = vmatprep.subr.bf16.mxu1 %v3040_v7 }
 0x2b0   : > { %v744_v51 = vpop.f32.mrb[4].mxu0  ;;  %v785_v52 = vpop.f32.mrb[4].mxu1 }
 0x2b1   : > { %v792_v53 = vadd.f32 %v744_v51, %v705_v49  ;;  %v746_v54 = vpop.f32.mrb[5].mxu0  ;;  %v787_v55 = vpop.f32.mrb[5].mxu1  ;;  %v794_v37 = vadd.f32 %v785_v52, %v707_v0  ;;  %v820_v49 = vstv %s699_s9  ;;  %s830_s9 = sadd.s32 %s3198_s5, %s829_s12  ;;  %s960_s12 = sadd.s32 %s3198_s5, %s959_s30 }
 0x2b2   : > { %v793_v57 = vadd.f32 %v746_v54, %v706_v50  ;;  %v748_v58 = vpop.f32.mrb[6].mxu0  ;;  %v789_v59 = vpop.f32.mrb[6].mxu1  ;;  %v795_v38 = vadd.f32 %v787_v55, %v708_v34  ;;  %vm821_vm1 = vcmp.gt.s32.totalorder %v3201_v36, %v820_v49 }
 0x2b3   : > { %v1983_v60 = vmul.f32 -1.442695, %v792_v53  ;;  %v749_v61 = vpop.f32.mrb[7].mxu0  ;;  %v790_v62 = vpop.f32.mrb[7].mxu1  ;;  %v1985_v39 = vmul.f32 -1.442695, %v794_v37 }
 0x2b4   : > { %v1984_v63 = vmul.f32 -1.442695, %v793_v57 }
 0x2b5   : > { %2250 = vpow2.f32 %v1983_v60 }
 0x2b6   : > { %2252 = vpow2.f32 %v1984_v63 }
 0x2b7   : > { %2254 = vtanh.f32 %v795_v38  ;;  %v1990_v38 = vld [vmem:[%s1776_s6 + $0x28] sm:$0xff] }
 0x2b8   : > { %2256 = vpow2.f32 %v1985_v39 }
 0x2bf   : > { %v2251_v40 = vpop.eup %2250 }
 0x2c0   : > { %v805_v41 = vadd.f32 1.0, %v2251_v40  ;;  %v2253_v43 = vpop.eup %2252 }
 0x2c1   : > { %v806_v44 = vadd.f32 1.0, %v2253_v43  ;;  %v2255_v45 = vpop.eup %2254 }
 0x2c2   : > { %2258 = vrcp.f32 %v805_v41  ;;  %v2257_v46 = vpop.eup %2256 }
 0x2c3   : > { %2260 = vrcp.f32 %v806_v44  ;;  %v807_v51 = vadd.f32 1.0, %v2257_v46 }
 0x2c5   : > { %2262 = vrcp.f32 %v807_v51 }
 0x2cc   : > { %v2259_v48 = vpop.eup %2258 }
 0x2cd   : > { %v816_v31 = vmul.f32 %v2259_v48, %v2255_v45  ;;  %v2261_v50 = vpop.eup %2260  ;;  %v838_v48 = vunpack.c.l.bf16 %v1990_v38 }
 0x2ce   : > { %v815_v52 = vmul.f32 %v2261_v50, %v3204_v42 }
 0x2cf   : > { %v2263_v55 = vpop.eup %2262 }
 0x2d0   : > { %v817_v53 = vadd.f32 %v816_v31, %v815_v52  ;;  %v839_v31 = vunpack.c.h.bf16 %v1990_v38 }
 0x2d2   : > { %2264 = vtanh.f32 %v817_v53  ;;  %v3254_v54 = vsel %vm821_vm1, %v817_v53, %v3204_v42  ;;  %v1989_v42 = vld [vmem:[%s1776_s6 + $0x20] sm:$0xff]  ;;  %s1783_s6 = scalar_lea.vmem %s2998_s3, %s1996_s27 [#allocation7] }
 0x2d3   : > { %v837_v61 = vunpack.c.h.bf16 %v1989_v42 }
 0x2dc   : > { %v2265_v56 = vpop.eup %2264 }
 0x2dd   : > { %v819_v57 = vmul.f32 %v2265_v56, %v2263_v55 }
 0x2df   : > { %v822_v58 = vsel %vm821_vm1, %v819_v57, 0.0  ;;  %v3259_v59 = vsel %vm821_vm1, %v819_v57, %v3209_v47  ;;  %v836_v47 = vunpack.c.l.bf16 %v1989_v42 }
 0x2e0   : > { %1987 = vst [vmem:[%s1772_s1 + $0x8] sm:$0xff] %v822_v58  ;;  %v840_v60 = vpack.c.bf16 %v3259_v59, %v3259_v59  ;;  %s1780_s1 = scalar_lea.vmem %s3014_s17, %s1994_s13 [#allocation10] }
 0x2e2   : > { %874 = vmatmul.mubr.bf16.vlgmr.msra.gmra.mrb[8].mxu0 %v840_v60  ;;  %915 = vmatmul.mubr.bf16.vlgmr.msra.gmra.mrb[8].mxu1 %v840_v60 }
 0x2e3   : > { %972 = vmatpush1.bf16.msra.mxu0 %v3023_v2  ;;  %1013 = vmatpush1.bf16.msra.mxu1 %v3043_v8 }
 0x2e4   : > { %973 = vmatprep.subr.bf16.mxu0 %v3029_v4  ;;  %1014 = vmatprep.subr.bf16.mxu1 %v3056_v11 }
 0x2e5   : > { %1003 = vmatprep.mubr.bf16.mxu0 %v2681_v3  ;;  %1044 = vmatprep.mubr.bf16.mxu1 %v2681_v3 }
 0x2e7   : > { %974 = vmatpush1.bf16.msra.mxu0 %v3033_v5  ;;  %1015 = vmatpush1.bf16.msra.mxu1 %v3059_v12 }
 0x2e8   : > { %975 = vmatprep.subr.bf16.mxu0 %v3037_v6  ;;  %1016 = vmatprep.subr.bf16.mxu1 %v3070_v15 }
 0x2eb   : > { %976 = vmatpush1.bf16.msra.mxu0 %v3047_v9  ;;  %1017 = vmatpush1.bf16.msra.mxu1 %v3075_v16 }
 0x2ec   : > { %977 = vmatprep.subr.bf16.mxu0 %v3052_v10  ;;  %1018 = vmatprep.subr.bf16.mxu1 %v3079_v17 }
 0x2ef   : > { %978 = vmatpush1.bf16.msra.mxu0 %v3064_v13  ;;  %1019 = vmatpush1.bf16.msra.mxu1 %v3091_v20 }
 0x2f0   : > { %979 = vmatprep.subr.bf16.mxu0 %v3067_v14  ;;  %1020 = vmatprep.subr.bf16.mxu1 %v3095_v21 }
 0x2f3   : > { %980 = vmatpush1.bf16.msra.mxu0 %v3083_v18  ;;  %1021 = vmatpush1.bf16.msra.mxu1 %v3107_v24 }
 0x2f4   : > { %981 = vmatprep.subr.bf16.mxu0 %v3087_v19  ;;  %1022 = vmatprep.subr.bf16.mxu1 %v3111_v25 }
 0x2f7   : > { %982 = vmatpush1.bf16.msra.mxu0 %v3098_v22  ;;  %1023 = vmatpush1.bf16.msra.mxu1 %v3123_v28 }
 0x2f8   : > { %983 = vmatprep.subr.bf16.mxu0 %v3102_v23  ;;  %1024 = vmatprep.subr.bf16.mxu1 %v3127_v29 }
 0x2fb   : > { %984 = vmatpush1.bf16.msra.mxu0 %v3115_v26  ;;  %1025 = vmatpush1.bf16.msra.mxu1 %v3138_v32 }
 0x2fc   : > { %985 = vmatprep.subr.bf16.mxu0 %v3119_v27  ;;  %1026 = vmatprep.subr.bf16.mxu1 %v3142_v33 }
 0x2ff   : > { %986 = vmatpush1.bf16.msra.mxu0 %v3131_v30  ;;  %1027 = vmatpush1.bf16.msra.mxu1 %v3149_v35 }
 0x300   : > { %1101 = vmatprep.subr.bf16.mxu0 %v3020_v1  ;;  %1142 = vmatprep.subr.bf16.mxu1 %v3040_v7 }
 0x3b5   : > { %v875_v62 = vpop.f32.mrb[8].mxu0  ;;  %v916_v63 = vpop.f32.mrb[8].mxu1 }
 0x3b6   : > { %v923_v0 = vadd.f32 %v875_v62, %v836_v47  ;;  %v877_v34 = vpop.f32.mrb[9].mxu0  ;;  %v918_v37 = vpop.f32.mrb[9].mxu1  ;;  %v925_v49 = vadd.f32 %v916_v63, %v838_v48  ;;  %v951_v47 = vstv %s830_s9  ;;  %s2002_s9 = sshll.u32 %s3822_s4, 3 }
 0x3b7   : > { %v924_v39 = vadd.f32 %v877_v34, %v837_v61  ;;  %v879_v40 = vpop.f32.mrb[10].mxu0  ;;  %v920_v41 = vpop.f32.mrb[10].mxu1  ;;  %v926_v50 = vadd.f32 %v918_v37, %v839_v31  ;;  %vm952_vm2 = vcmp.gt.s32.totalorder %v3201_v36, %v951_v47  ;;  %s1786_s13 = scalar_lea.vmem %s3014_s17, %s2002_s9 [#allocation10] }
 0x3b8   : > { %v1991_v43 = vmul.f32 -1.442695, %v923_v0  ;;  %v880_v44 = vpop.f32.mrb[11].mxu0  ;;  %v921_v45 = vpop.f32.mrb[11].mxu1  ;;  %v1993_v51 = vmul.f32 -1.442695, %v925_v49 }
 0x3b9   : > { %v1992_v46 = vmul.f32 -1.442695, %v924_v39 }
 0x3ba   : > { %2266 = vpow2.f32 %v1991_v43 }
 0x3bb   : > { %2268 = vpow2.f32 %v1992_v46 }
 0x3bc   : > { %2270 = vtanh.f32 %v926_v50  ;;  %v1998_v50 = vld [vmem:[%s1783_s6 + $0x38] sm:$0xff] }
 0x3bd   : > { %2272 = vpow2.f32 %v1993_v51 }
 0x3c4   : > { %v2267_v52 = vpop.eup %2266 }
 0x3c5   : > { %v936_v53 = vadd.f32 1.0, %v2267_v52  ;;  %v2269_v55 = vpop.eup %2268 }
 0x3c6   : > { %v937_v56 = vadd.f32 1.0, %v2269_v55  ;;  %v2271_v57 = vpop.eup %2270 }
 0x3c7   : > { %2274 = vrcp.f32 %v936_v53  ;;  %v2273_v58 = vpop.eup %2272 }
 0x3c8   : > { %2276 = vrcp.f32 %v937_v56  ;;  %v938_v62 = vadd.f32 1.0, %v2273_v58  ;;  %v968_v58 = vunpack.c.l.bf16 %v1998_v50 }
 0x3ca   : > { %2278 = vrcp.f32 %v938_v62 }
 0x3d1   : > { %v2275_v60 = vpop.eup %2274 }
 0x3d2   : > { %v947_v42 = vmul.f32 %v2275_v60, %v2271_v57  ;;  %v2277_v61 = vpop.eup %2276  ;;  %v969_v60 = vunpack.c.h.bf16 %v1998_v50 }
 0x3d3   : > { %v946_v63 = vmul.f32 %v2277_v61, %v3254_v54 }
 0x3d4   : > { %v2279_v37 = vpop.eup %2278 }
 0x3d5   : > { %v948_v0 = vadd.f32 %v947_v42, %v946_v63 }
 0x3d7   : > { %2280 = vtanh.f32 %v948_v0  ;;  %v3304_v34 = vsel %vm952_vm2, %v948_v0, %v3254_v54  ;;  %v1997_v54 = vld [vmem:[%s1783_s6 + $0x30] sm:$0xff] }
 0x3d8   : > { %v967_v44 = vunpack.c.h.bf16 %v1997_v54 }
 0x3e1   : > { %v2281_v38 = vpop.eup %2280 }
 0x3e2   : > { %v950_v39 = vmul.f32 %v2281_v38, %v2279_v37 }
 0x3e4   : > { %v953_v40 = vsel %vm952_vm2, %v950_v39, 0.0  ;;  %v3309_v41 = vsel %vm952_vm2, %v950_v39, %v3259_v59  ;;  %v966_v59 = vunpack.c.l.bf16 %v1997_v54  ;;  %v1081_v54 = vstv %s960_s12 }
 0x3e5   : > { %1995 = vst [vmem:[%s1780_s1 + $0x10] sm:$0xff] %v953_v40  ;;  %v970_v43 = vpack.c.bf16 %v3309_v41, %v3309_v41  ;;  %vm1082_vm3 = vcmp.gt.s32.totalorder %v3201_v36, %v1081_v54  ;;  %s3401_s1 = ssub.s32 4, %s3822_s4  ;;  %v3454_v54 = vld [vmem:[%s3005_s7 + $0x40] ss:$16 sps:$4 sm:$0xff]  }
 0x3e6   : > { %s2049_s27 = sshll.u32 %s3401_s1, 4  ;;  %s1090_s30 = sadd.s32 %s3198_s5, %s3401_s1 }
 0x3e7   : > { %1004 = vmatmul.mubr.bf16.vlgmr.msra.gmra.mrb[12].mxu0 %v970_v43  ;;  %1045 = vmatmul.mubr.bf16.vlgmr.msra.gmra.mrb[12].mxu1 %v970_v43  ;;  %s1093_s6 = scalar_lea.vmem %s2998_s3, %s2049_s27 [#allocation7]  ;;  %s2009_s12 = sshll.u32 %s3401_s1, 3 }
 0x3e8   : > { %1102 = vmatpush1.bf16.msra.mxu0 %v3023_v2  ;;  %1143 = vmatpush1.bf16.msra.mxu1 %v3043_v8  ;;  %s1215_s9 = scalar_lea.vmem %s3014_s17, %s2009_s12 [#allocation10] }
 0x3e9   : > { %1103 = vmatprep.subr.bf16.mxu0 %v3029_v4  ;;  %1144 = vmatprep.subr.bf16.mxu1 %v3056_v11 }
 0x3ea   : > { %1133 = vmatprep.mubr.bf16.mxu0 %v2681_v3  ;;  %1174 = vmatprep.mubr.bf16.mxu1 %v2681_v3 }
 0x3ec   : > { %1104 = vmatpush1.bf16.msra.mxu0 %v3033_v5  ;;  %1145 = vmatpush1.bf16.msra.mxu1 %v3059_v12 }
 0x3ed   : > { %1105 = vmatprep.subr.bf16.mxu0 %v3037_v6  ;;  %1146 = vmatprep.subr.bf16.mxu1 %v3070_v15 }
 0x3f0   : > { %1106 = vmatpush1.bf16.msra.mxu0 %v3047_v9  ;;  %1147 = vmatpush1.bf16.msra.mxu1 %v3075_v16 }
 0x3f1   : > { %1107 = vmatprep.subr.bf16.mxu0 %v3052_v10  ;;  %1148 = vmatprep.subr.bf16.mxu1 %v3079_v17 }
 0x3f4   : > { %1108 = vmatpush1.bf16.msra.mxu0 %v3064_v13  ;;  %1149 = vmatpush1.bf16.msra.mxu1 %v3091_v20 }
 0x3f5   : > { %1109 = vmatprep.subr.bf16.mxu0 %v3067_v14  ;;  %1150 = vmatprep.subr.bf16.mxu1 %v3095_v21 }
 0x3f8   : > { %1110 = vmatpush1.bf16.msra.mxu0 %v3083_v18  ;;  %1151 = vmatpush1.bf16.msra.mxu1 %v3107_v24 }
 0x3f9   : > { %1111 = vmatprep.subr.bf16.mxu0 %v3087_v19  ;;  %1152 = vmatprep.subr.bf16.mxu1 %v3111_v25 }
 0x3fc   : > { %1112 = vmatpush1.bf16.msra.mxu0 %v3098_v22  ;;  %1153 = vmatpush1.bf16.msra.mxu1 %v3123_v28 }
 0x3fd   : > { %1113 = vmatprep.subr.bf16.mxu0 %v3102_v23  ;;  %1154 = vmatprep.subr.bf16.mxu1 %v3127_v29 }
 0x400   : > { %1114 = vmatpush1.bf16.msra.mxu0 %v3115_v26  ;;  %1155 = vmatpush1.bf16.msra.mxu1 %v3138_v32 }
 0x401   : > { %1115 = vmatprep.subr.bf16.mxu0 %v3119_v27  ;;  %1156 = vmatprep.subr.bf16.mxu1 %v3142_v33 }
 0x404   : > { %1116 = vmatpush1.bf16.msra.mxu0 %v3131_v30  ;;  %1157 = vmatpush1.bf16.msra.mxu1 %v3149_v35 }
 0x405   : > { %1232 = vmatprep.subr.bf16.mxu0 %v3020_v1  ;;  %1273 = vmatprep.subr.bf16.mxu1 %v3040_v7 }
 0x4ba   : > { %v1005_v45 = vpop.f32.mrb[12].mxu0  ;;  %v1046_v46 = vpop.f32.mrb[12].mxu1 }
 0x4bb   : > { %v1053_v48 = vadd.f32 %v1005_v45, %v966_v59  ;;  %v1007_v31 = vpop.f32.mrb[13].mxu0  ;;  %v1048_v49 = vpop.f32.mrb[13].mxu1  ;;  %v1055_v42 = vadd.f32 %v1046_v46, %v968_v58 }
 0x4bc   : > { %v1054_v51 = vadd.f32 %v1007_v31, %v967_v44  ;;  %v1009_v52 = vpop.f32.mrb[14].mxu0  ;;  %v1050_v53 = vpop.f32.mrb[14].mxu1  ;;  %v1056_v47 = vadd.f32 %v1048_v49, %v969_v60 }
 0x4bd   : > { %v1999_v55 = vmul.f32 -1.442695, %v1053_v48  ;;  %v1010_v56 = vpop.f32.mrb[15].mxu0  ;;  %v1051_v57 = vpop.f32.mrb[15].mxu1  ;;  %v2001_v61 = vmul.f32 -1.442695, %v1055_v42 }
 0x4be   : > { %v2000_v1 = vmul.f32 -1.442695, %v1054_v51 }
 0x4bf   : > { %2282 = vpow2.f32 %v1999_v55 }
 0x4c0   : > { %2284 = vpow2.f32 %v2000_v1 }
 0x4c1   : > { %2286 = vtanh.f32 %v1056_v47 }
 0x4c2   : > { %2288 = vpow2.f32 %v2001_v61 }
 0x4c9   : > { %v2283_v62 = vpop.eup %2282 }
 0x4ca   : > { %v1066_v63 = vadd.f32 1.0, %v2283_v62  ;;  %v2285_v0 = vpop.eup %2284  ;;  %v3420_v62 = vld [vmem:[%s3005_s7] ss:$16 sps:$4 sm:$0xff]  }
 0x4cb   : > { %v1067_v37 = vadd.f32 1.0, %v2285_v0  ;;  %v2287_v38 = vpop.eup %2286  ;;  %v3428_v0 = vld [vmem:[%s3005_s7 + $0x24] ss:$16 sps:$4 sm:$0xff]  }
 0x4cc   : > { %2290 = vrcp.f32 %v1066_v63  ;;  %v2289_v39 = vpop.eup %2288  ;;  %v3424_v63 = vld [vmem:[%s3005_s7 + $0x8] ss:$16 sps:$4 sm:$0xff]  }
 0x4cd   : > { %2292 = vrcp.f32 %v1067_v37  ;;  %v1068_v44 = vadd.f32 1.0, %v2289_v39  ;;  %v3432_v37 = vld [vmem:[%s3005_s7 + $0x2c] ss:$16 sps:$4 sm:$0xff]   ;;  %v3442_v39 = vld [vmem:[%s3005_s7 + $0x28] ss:$16 sps:$4 sm:$0xff]  }
 0x4cf   : > { %2294 = vrcp.f32 %v1068_v44  ;;  %v3462_v44 = vld [vmem:[%s3005_s7 + $0x64] ss:$16 sps:$4 sm:$0xff]  }
 0x4d6   : > { %v2291_v40 = vpop.eup %2290 }
 0x4d7   : > { %v1077_v43 = vmul.f32 %v2291_v40, %v2287_v38  ;;  %v2293_v59 = vpop.eup %2292  ;;  %v3438_v38 = vld [vmem:[%s3005_s7 + $0x20] ss:$16 sps:$4 sm:$0xff]   ;;  %v3446_v40 = vld [vmem:[%s3005_s7 + $0x44] ss:$16 sps:$4 sm:$0xff]  }
 0x4d8   : > { %v1076_v45 = vmul.f32 %v2293_v59, %v3304_v34  ;;  %v3458_v59 = vld [vmem:[%s3005_s7 + $0x48] ss:$16 sps:$4 sm:$0xff]  }
 0x4d9   : > { %v2295_v31 = vpop.eup %2294 }
 0x4da   : > { %v1078_v46 = vadd.f32 %v1077_v43, %v1076_v45  ;;  %v3450_v43 = vld [vmem:[%s3005_s7 + $0x4c] ss:$16 sps:$4 sm:$0xff]  }
 0x4db   : > { %v3466_v45 = vld [vmem:[%s3005_s7 + $0x6c] ss:$16 sps:$4 sm:$0xff]  }
 0x4dc   : > { %2296 = vtanh.f32 %v1078_v46  ;;  %v3354_v48 = vsel %vm1082_vm3, %v1078_v46, %v3304_v34  ;;  %v3470_v46 = vld [vmem:[%s3005_s7 + $0x60] ss:$16 sps:$4 sm:$0xff]  }
 0x4e6   : > { %v2297_v49 = vpop.eup %2296 }
 0x4e7   : > { %v1080_v50 = vmul.f32 %v2297_v49, %v2295_v31  ;;  %v3478_v31 = vld [vmem:[%s3005_s7 + $0x84] ss:$16 sps:$4 sm:$0xff]   ;;  %v3482_v49 = vld [vmem:[%s3005_s7 + $0x8c] ss:$16 sps:$4 sm:$0xff]  }
 0x4e9   : > { %v1083_v51 = vsel %vm1082_vm3, %v1080_v50, 0.0  ;;  %v3359_v52 = vsel %vm1082_vm3, %v1080_v50, %v3309_v41  ;;  %v3486_v50 = vld [vmem:[%s3005_s7 + $0x80] ss:$16 sps:$4 sm:$0xff]  }
 0x4ea   : > { %2003 = vst [vmem:[%s1786_s13 + $0x18] sm:$0xff] %v1083_v51  ;;  %v1100_v53 = vpack.c.bf16 %v3359_v52, %v3359_v52  ;;  %v3490_v51 = vld [vmem:[%s3005_s7 + $0x88] ss:$16 sps:$4 sm:$0xff]   ;;  %s2010_s13 = smul.u32 4294967248, %s3822_s4 }
 0x4ec   : > { %1134 = vmatmul.mubr.bf16.vlgmr.msra.gmra.mrb[16].mxu0 %v1100_v53  ;;  %1175 = vmatmul.mubr.bf16.vlgmr.msra.gmra.mrb[16].mxu1 %v1100_v53  ;;  %v3498_v53 = vld [vmem:[%s3005_s7 + $0xac] ss:$16 sps:$4 sm:$0xff]   ;;  %s1794_s1 = scalar_lea.vmem %s2998_s3, %s2010_s13 [#allocation7] }
 0x4ed   : > { %1233 = vmatpush1.bf16.msra.mxu0 %v3023_v2  ;;  %1274 = vmatpush1.bf16.msra.mxu1 %v3043_v8  ;;  %v3396_v2 = vld [vmem:[%s3005_s7 + $0x4] ss:$16 sps:$4 sm:$0xff]  }
 0x4ee   : > { %1234 = vmatprep.subr.bf16.mxu0 %v3029_v4  ;;  %1275 = vmatprep.subr.bf16.mxu1 %v3056_v11  ;;  %v1094_v4 = vld [vmem:[%s1093_s6] sm:$0xff] }
 0x4ef   : > { %1264 = vmatprep.mubr.bf16.mxu0 %v2681_v3  ;;  %1305 = vmatprep.mubr.bf16.mxu1 %v2681_v3 }
 0x4f1   : > { %1235 = vmatpush1.bf16.msra.mxu0 %v3033_v5  ;;  %1276 = vmatpush1.bf16.msra.mxu1 %v3059_v12  ;;  %v1096_v5 = vunpack.c.l.bf16 %v1094_v4 }
 0x4f2   : > { %1236 = vmatprep.subr.bf16.mxu0 %v3037_v6  ;;  %1277 = vmatprep.subr.bf16.mxu1 %v3070_v15  ;;  %v1097_v6 = vunpack.c.h.bf16 %v1094_v4  ;;  %v3502_v4 = vld [vmem:[%s3005_s7 + $0xa0] ss:$16 sps:$4 sm:$0xff]  }
 0x4f5   : > { %1237 = vmatpush1.bf16.msra.mxu0 %v3047_v9  ;;  %1278 = vmatpush1.bf16.msra.mxu1 %v3075_v16 }
 0x4f6   : > { %1238 = vmatprep.subr.bf16.mxu0 %v3052_v10  ;;  %1279 = vmatprep.subr.bf16.mxu1 %v3079_v17 }
 0x4f9   : > { %1239 = vmatpush1.bf16.msra.mxu0 %v3064_v13  ;;  %1280 = vmatpush1.bf16.msra.mxu1 %v3091_v20  ;;  %v1095_v13 = vld [vmem:[%s1093_s6 + $0x8] sm:$0xff] }
 0x4fa   : > { %1240 = vmatprep.subr.bf16.mxu0 %v3067_v14  ;;  %1281 = vmatprep.subr.bf16.mxu1 %v3095_v21  ;;  %v1098_v20 = vunpack.c.l.bf16 %v1095_v13  ;;  %v1099_v21 = vunpack.c.h.bf16 %v1095_v13  ;;  %v3534_v13 = vld [vmem:[%s3005_s7 + $0xe0] ss:$16 sps:$4 sm:$0xff]  }
 0x4fd   : > { %1241 = vmatpush1.bf16.msra.mxu0 %v3083_v18  ;;  %1282 = vmatpush1.bf16.msra.mxu1 %v3107_v24 }
 0x4fe   : > { %1242 = vmatprep.subr.bf16.mxu0 %v3087_v19  ;;  %1283 = vmatprep.subr.bf16.mxu1 %v3111_v25 }
 0x501   : > { %1243 = vmatpush1.bf16.msra.mxu0 %v3098_v22  ;;  %1284 = vmatpush1.bf16.msra.mxu1 %v3123_v28 }
 0x502   : > { %1244 = vmatprep.subr.bf16.mxu0 %v3102_v23  ;;  %1285 = vmatprep.subr.bf16.mxu1 %v3127_v29 }
 0x505   : > { %1245 = vmatpush1.bf16.msra.mxu0 %v3115_v26  ;;  %1286 = vmatpush1.bf16.msra.mxu1 %v3138_v32 }
 0x506   : > { %1246 = vmatprep.subr.bf16.mxu0 %v3119_v27  ;;  %1287 = vmatprep.subr.bf16.mxu1 %v3142_v33  ;;  %v1211_v33 = vstv %s1090_s30  ;;  %s2016_s30 = smul.u32 4294967272, %s3822_s4 }
 0x507   : > { %vm1212_vm4 = vcmp.gt.s32.totalorder %v3201_v36, %v1211_v33 }
 0x508   : > { %s1798_s12 = scalar_lea.vmem %s3014_s17, %s2016_s30 [#allocation10] }
 0x509   : > { %1247 = vmatpush1.bf16.msra.mxu0 %v3131_v30  ;;  %1288 = vmatpush1.bf16.msra.mxu1 %v3149_v35 }
 0x50a   : > { %1363 = vmatprep.subr.bf16.mxu0 %v3396_v2  ;;  %1404 = vmatprep.subr.bf16.mxu1 %v3040_v7 }
 0x5bf   : > { %v1135_v8 = vpop.f32.mrb[16].mxu0  ;;  %v1176_v9 = vpop.f32.mrb[16].mxu1 }
 0x5c0   : > { %v1183_v10 = vadd.f32 %v1135_v8, %v1096_v5  ;;  %v1137_v11 = vpop.f32.mrb[17].mxu0  ;;  %v1178_v12 = vpop.f32.mrb[17].mxu1  ;;  %v1185_v22 = vadd.f32 %v1176_v9, %v1098_v20  ;;  %v3506_v5 = vld [vmem:[%s3005_s7 + $0xa8] ss:$16 sps:$4 sm:$0xff]   ;;  %v3514_v8 = vld [vmem:[%s3005_s7 + $0xcc] ss:$16 sps:$4 sm:$0xff]  }
 0x5c1   : > { %v1184_v14 = vadd.f32 %v1137_v11, %v1097_v6  ;;  %v1139_v15 = vpop.f32.mrb[18].mxu0  ;;  %v1180_v16 = vpop.f32.mrb[18].mxu1  ;;  %v1186_v23 = vadd.f32 %v1178_v12, %v1099_v21  ;;  %v3510_v6 = vld [vmem:[%s3005_s7 + $0xc4] ss:$16 sps:$4 sm:$0xff]   ;;  %v3518_v9 = vld [vmem:[%s3005_s7 + $0xc0] ss:$16 sps:$4 sm:$0xff]  }
 0x5c2   : > { %v2006_v17 = vmul.f32 -1.442695, %v1183_v10  ;;  %v1140_v18 = vpop.f32.mrb[19].mxu0  ;;  %v1181_v7 = vpop.f32.mrb[19].mxu1  ;;  %v2008_v24 = vmul.f32 -1.442695, %v1185_v22 }
 0x5c3   : > { %v2007_v19 = vmul.f32 -1.442695, %v1184_v14  ;;  %v3522_v10 = vld [vmem:[%s3005_s7 + $0xc8] ss:$16 sps:$4 sm:$0xff]   ;;  %v3526_v11 = vld [vmem:[%s3005_s7 + $0xe4] ss:$16 sps:$4 sm:$0xff]  }
 0x5c4   : > { %2298 = vpow2.f32 %v2006_v17  ;;  %v3530_v12 = vld [vmem:[%s3005_s7 + $0xec] ss:$16 sps:$4 sm:$0xff]   ;;  %v3538_v14 = vld [vmem:[%s3005_s7 + $0xe8] ss:$16 sps:$4 sm:$0xff]  }
 0x5c5   : > { %2300 = vpow2.f32 %v2007_v19  ;;  %v2393_v15 = vld [vmem:[%s3005_s7 + $0xc] ss:$16 sps:$4 sm:$0xff]  }
 0x5c6   : > { %2302 = vtanh.f32 %v1186_v23  ;;  %v2011_v16 = vld [vmem:[%s1794_s1 + $0x50] sm:$0xff]  ;;  %v2012_v23 = vld [vmem:[%s1794_s1 + $0x58] sm:$0xff]  ;;  %s1350_s1 = smul.u32 4294967291, %s3822_s4 }
 0x5c7   : > { %2304 = vpow2.f32 %v2008_v24  ;;  %v1227_v17 = vunpack.c.l.bf16 %v2011_v16  ;;  %v1228_v18 = vunpack.c.h.bf16 %v2011_v16 }
 0x5ce   : > { %v2299_v25 = vpop.eup %2298 }
 0x5cf   : > { %v1196_v26 = vadd.f32 1.0, %v2299_v25  ;;  %v2301_v27 = vpop.eup %2300 }
 0x5d0   : > { %v1197_v28 = vadd.f32 1.0, %v2301_v27  ;;  %v2303_v29 = vpop.eup %2302 }
 0x5d1   : > { %2306 = vrcp.f32 %v1196_v26  ;;  %v2305_v30 = vpop.eup %2304 }
 0x5d2   : > { %2308 = vrcp.f32 %v1197_v28  ;;  %v1198_v41 = vadd.f32 1.0, %v2305_v30  ;;  %v1229_v30 = vunpack.c.l.bf16 %v2012_v23 }
 0x5d4   : > { %2310 = vrcp.f32 %v1198_v41 }
 0x5db   : > { %v2307_v32 = vpop.eup %2306 }
 0x5dc   : > { %v1207_v35 = vmul.f32 %v2307_v32, %v2303_v29  ;;  %v2309_v34 = vpop.eup %2308  ;;  %v1230_v32 = vunpack.c.h.bf16 %v2012_v23 }
 0x5dd   : > { %v1206_v55 = vmul.f32 %v2309_v34, %v3354_v48 }
 0x5de   : > { %v2311_v1 = vpop.eup %2310 }
 0x5df   : > { %v1208_v56 = vadd.f32 %v1207_v35, %v1206_v55 }
 0x5e1   : > { %2312 = vtanh.f32 %v1208_v56  ;;  %v3410_v57 = vsel %vm1212_vm4, %v1208_v56, %v3354_v48  ;;  %v3474_v48 = vld [vmem:[%s3005_s7 + $0x68] ss:$16 sps:$4 sm:$0xff]  }
 0x5eb   : > { %v2313_v58 = vpop.eup %2312 }
 0x5ec   : > { %v1210_v60 = vmul.f32 %v2313_v58, %v2311_v1 }
 0x5ee   : > { %v1213_v42 = vsel %vm1212_vm4, %v1210_v60, 0.0  ;;  %v3415_v47 = vsel %vm1212_vm4, %v1210_v60, %v3359_v52  ;;  %v3494_v52 = vld [vmem:[%s3005_s7 + $0xa4] ss:$16 sps:$4 sm:$0xff]   ;;  %s1219_s7 = smul.u32 4294967293, %s3822_s4 }
 0x5ef   : > { %1216 = vst [vmem:[%s1215_s9] sm:$0xff] %v1213_v42  ;;  %v1231_v61 = vpack.c.bf16 %v3415_v47, %v3415_v47  ;;  %s2018_s9 = smul.u32 4294967216, %s3822_s4 }
 0x5f0   : > { %s1220_s27 = sadd.s32 5, %s1219_s7  ;;  %s1351_s7 = sadd.s32 6, %s1350_s1 }
 0x5f1   : > { %1265 = vmatmul.mubr.bf16.vlgmr.msra.gmra.mrb[20].mxu0 %v1231_v61  ;;  %1306 = vmatmul.mubr.bf16.vlgmr.msra.gmra.mrb[20].mxu1 %v1231_v61  ;;  %s1221_s6 = sadd.s32 %s3198_s5, %s1220_s27  ;;  %s1802_s13 = scalar_lea.vmem %s2998_s3, %s2018_s9 [#allocation7] }
 0x5f2   : > { %1364 = vmatpush1.bf16.msra.mxu0 %v3420_v62  ;;  %1405 = vmatpush1.bf16.msra.mxu1 %v3424_v63  ;;  %s1352_s27 = sadd.s32 %s3198_s5, %s1351_s7  ;;  %s2032_s7 = smul.u32 4294967240, %s3822_s4 }
 0x5f3   : > { %1365 = vmatprep.subr.bf16.mxu0 %v3428_v0  ;;  %1406 = vmatprep.subr.bf16.mxu1 %v3432_v37 }
 0x5f4   : > { %1395 = vmatprep.mubr.bf16.mxu0 %v2681_v3  ;;  %1436 = vmatprep.mubr.bf16.mxu1 %v2681_v3 }
 0x5f6   : > { %1366 = vmatpush1.bf16.msra.mxu0 %v3438_v38  ;;  %1407 = vmatpush1.bf16.msra.mxu1 %v3442_v39 }
 0x5f7   : > { %1367 = vmatprep.subr.bf16.mxu0 %v3446_v40  ;;  %1408 = vmatprep.subr.bf16.mxu1 %v3450_v43 }
 0x5fa   : > { %1368 = vmatpush1.bf16.msra.mxu0 %v3454_v54  ;;  %1409 = vmatpush1.bf16.msra.mxu1 %v3458_v59 }
 0x5fb   : > { %1369 = vmatprep.subr.bf16.mxu0 %v3462_v44  ;;  %1410 = vmatprep.subr.bf16.mxu1 %v3466_v45 }
 0x5fe   : > { %1370 = vmatpush1.bf16.msra.mxu0 %v3470_v46  ;;  %1411 = vmatpush1.bf16.msra.mxu1 %v3474_v48 }
 0x5ff   : > { %1371 = vmatprep.subr.bf16.mxu0 %v3478_v31  ;;  %1412 = vmatprep.subr.bf16.mxu1 %v3482_v49 }
 0x602   : > { %1372 = vmatpush1.bf16.msra.mxu0 %v3486_v50  ;;  %1413 = vmatpush1.bf16.msra.mxu1 %v3490_v51 }
 0x603   : > { %1373 = vmatprep.subr.bf16.mxu0 %v3494_v52  ;;  %1414 = vmatprep.subr.bf16.mxu1 %v3498_v53 }
 0x606   : > { %1374 = vmatpush1.bf16.msra.mxu0 %v3502_v4  ;;  %1415 = vmatpush1.bf16.msra.mxu1 %v3506_v5 }
 0x607   : > { %1375 = vmatprep.subr.bf16.mxu0 %v3510_v6  ;;  %1416 = vmatprep.subr.bf16.mxu1 %v3514_v8 }
 0x60a   : > { %1376 = vmatpush1.bf16.msra.mxu0 %v3518_v9  ;;  %1417 = vmatpush1.bf16.msra.mxu1 %v3522_v10 }
 0x60b   : > { %1377 = vmatprep.subr.bf16.mxu0 %v3526_v11  ;;  %1418 = vmatprep.subr.bf16.mxu1 %v3530_v12 }
 0x60e   : > { %1378 = vmatpush1.bf16.msra.mxu0 %v3534_v13  ;;  %1419 = vmatpush1.bf16.msra.mxu1 %v3538_v14 }
 0x60f   : > { %1494 = vmatprep.subr.bf16.mxu0 %v3396_v2  ;;  %1535 = vmatprep.subr.bf16.mxu1 %v2393_v15  ;;  %v1342_v15 = vstv %s1221_s6  ;;  %s2024_s6 = smul.u32 4294967256, %s3822_s4 }
 0x610   : > { %vm1343_vm5 = vcmp.gt.s32.totalorder %v3201_v36, %v1342_v15 }
 0x611   : > { %s1806_s30 = scalar_lea.vmem %s3014_s17, %s2024_s6 [#allocation10] }
 0x6c4   : > { %v1266_v7 = vpop.f32.mrb[20].mxu0  ;;  %v1307_v19 = vpop.f32.mrb[20].mxu1 }
 0x6c5   : > { %v1314_v20 = vadd.f32 %v1266_v7, %v1227_v17  ;;  %v1268_v21 = vpop.f32.mrb[21].mxu0  ;;  %v1309_v22 = vpop.f32.mrb[21].mxu1  ;;  %v1316_v33 = vadd.f32 %v1307_v19, %v1229_v30 }
 0x6c6   : > { %v1315_v24 = vadd.f32 %v1268_v21, %v1228_v18  ;;  %v1270_v25 = vpop.f32.mrb[22].mxu0  ;;  %v1311_v26 = vpop.f32.mrb[22].mxu1  ;;  %v1317_v35 = vadd.f32 %v1309_v22, %v1230_v32 }
 0x6c7   : > { %v2013_v27 = vmul.f32 -1.442695, %v1314_v20  ;;  %v1271_v28 = vpop.f32.mrb[23].mxu0  ;;  %v1312_v29 = vpop.f32.mrb[23].mxu1  ;;  %v2015_v34 = vmul.f32 -1.442695, %v1316_v33 }
 0x6c8   : > { %v2014_v2 = vmul.f32 -1.442695, %v1315_v24 }
 0x6c9   : > { %2314 = vpow2.f32 %v2013_v27 }
 0x6ca   : > { %2316 = vpow2.f32 %v2014_v2 }
 0x6cb   : > { %2318 = vtanh.f32 %v1317_v35 }
 0x6cc   : > { %2320 = vpow2.f32 %v2015_v34 }
 0x6d3   : > { %v2315_v41 = vpop.eup %2314 }
 0x6d4   : > { %v1327_v55 = vadd.f32 1.0, %v2315_v41  ;;  %v2317_v56 = vpop.eup %2316 }
 0x6d5   : > { %v1328_v1 = vadd.f32 1.0, %v2317_v56  ;;  %v2319_v58 = vpop.eup %2318 }
 0x6d6   : > { %2322 = vrcp.f32 %v1327_v55  ;;  %v2321_v60 = vpop.eup %2320 }
 0x6d7   : > { %2324 = vrcp.f32 %v1328_v1  ;;  %v1329_v17 = vadd.f32 1.0, %v2321_v60 }
 0x6d9   : > { %2326 = vrcp.f32 %v1329_v17 }
 0x6e0   : > { %v2323_v42 = vpop.eup %2322 }
 0x6e1   : > { %v1338_v61 = vmul.f32 %v2323_v42, %v2319_v58  ;;  %v2325_v16 = vpop.eup %2324 }
 0x6e2   : > { %v1337_v18 = vmul.f32 %v2325_v16, %v3410_v57 }
 0x6e3   : > { %v2327_v20 = vpop.eup %2326 }
 0x6e4   : > { %v1339_v7 = vadd.f32 %v1338_v61, %v1337_v18 }
 0x6e6   : > { %2328 = vtanh.f32 %v1339_v7  ;;  %v3550_v19 = vsel %vm1343_vm5, %v1339_v7, %v3410_v57 }
 0x6f0   : > { %v2329_v21 = vpop.eup %2328 }
 0x6f1   : > { %v1341_v22 = vmul.f32 %v2329_v21, %v2327_v20 }
 0x6f3   : > { %v1344_v23 = vsel %vm1343_vm5, %v1341_v22, 0.0  ;;  %v3555_v24 = vsel %vm1343_vm5, %v1341_v22, %v3415_v47 }
 0x6f4   : > { %2017 = vst [vmem:[%s1798_s12 + $0x28] sm:$0xff] %v1344_v23  ;;  %v1362_v25 = vpack.c.bf16 %v3555_v24, %v3555_v24  ;;  %s2026_s12 = smul.u32 4294967184, %s3822_s4 }
 0x6f6   : > { %1396 = vmatmul.mubr.bf16.vlgmr.msra.gmra.mrb[24].mxu0 %v1362_v25  ;;  %1437 = vmatmul.mubr.bf16.vlgmr.msra.gmra.mrb[24].mxu1 %v1362_v25  ;;  %s1810_s9 = scalar_lea.vmem %s2998_s3, %s2026_s12 [#allocation7]  ;;  %s1481_s3 = smul.u32 4294967289, %s3822_s4 }
 0x6f7   : > { %1495 = vmatpush1.bf16.msra.mxu0 %v3420_v62  ;;  %1536 = vmatpush1.bf16.msra.mxu1 %v3424_v63  ;;  %v2027_v35 = vld [vmem:[%s1810_s9 + $0x70] sm:$0xff]  ;;  %v2028_v42 = vld [vmem:[%s1810_s9 + $0x78] sm:$0xff] }
 0x6f8   : > { %1496 = vmatprep.subr.bf16.mxu0 %v3428_v0  ;;  %1537 = vmatprep.subr.bf16.mxu1 %v3432_v37  ;;  %v1489_v34 = vunpack.c.l.bf16 %v2027_v35  ;;  %v1490_v41 = vunpack.c.h.bf16 %v2027_v35  ;;  %v1491_v20 = vunpack.c.l.bf16 %v2028_v42  ;;  %v1492_v21 = vunpack.c.h.bf16 %v2028_v42 }
 0x6f9   : > { %1526 = vmatprep.mubr.bf16.mxu0 %v2681_v3  ;;  %1567 = vmatprep.mubr.bf16.mxu1 %v2681_v3  ;;  %v2019_v3 = vld [vmem:[%s1802_s13 + $0x60] sm:$0xff] }
 0x6fa   : > { %v1358_v36 = vunpack.c.l.bf16 %v2019_v3  ;;  %v1359_v57 = vunpack.c.h.bf16 %v2019_v3 }
 0x6fb   : > { %1497 = vmatpush1.bf16.msra.mxu0 %v3438_v38  ;;  %1538 = vmatpush1.bf16.msra.mxu1 %v3442_v39  ;;  %v2020_v38 = vld [vmem:[%s1802_s13 + $0x68] sm:$0xff]  ;;  %s1482_s13 = sadd.s32 7, %s1481_s3 }
 0x6fc   : > { %1498 = vmatprep.subr.bf16.mxu0 %v3446_v40  ;;  %1539 = vmatprep.subr.bf16.mxu1 %v3450_v43  ;;  %s1483_s1 = sadd.s32 %s3198_s5, %s1482_s13  ;;  %s1814_s5 = scalar_lea.vmem %s3014_s17, %s2032_s7 [#allocation10] }
 0x6ff   : > { %1499 = vmatpush1.bf16.msra.mxu0 %v3454_v54  ;;  %1540 = vmatpush1.bf16.msra.mxu1 %v3458_v59 }
 0x700   : > { %1500 = vmatprep.subr.bf16.mxu0 %v3462_v44  ;;  %1541 = vmatprep.subr.bf16.mxu1 %v3466_v45 }
 0x703   : > { %1501 = vmatpush1.bf16.msra.mxu0 %v3470_v46  ;;  %1542 = vmatpush1.bf16.msra.mxu1 %v3474_v48  ;;  %v1360_v46 = vunpack.c.l.bf16 %v2020_v38  ;;  %v1361_v48 = vunpack.c.h.bf16 %v2020_v38 }
 0x704   : > { %1502 = vmatprep.subr.bf16.mxu0 %v3478_v31  ;;  %1543 = vmatprep.subr.bf16.mxu1 %v3482_v49 }
 0x707   : > { %1503 = vmatpush1.bf16.msra.mxu0 %v3486_v50  ;;  %1544 = vmatpush1.bf16.msra.mxu1 %v3490_v51 }
 0x708   : > { %1504 = vmatprep.subr.bf16.mxu0 %v3494_v52  ;;  %1545 = vmatprep.subr.bf16.mxu1 %v3498_v53 }
 0x70b   : > { %1505 = vmatpush1.bf16.msra.mxu0 %v3502_v4  ;;  %1546 = vmatpush1.bf16.msra.mxu1 %v3506_v5 }
 0x70c   : > { %1506 = vmatprep.subr.bf16.mxu0 %v3510_v6  ;;  %1547 = vmatprep.subr.bf16.mxu1 %v3514_v8 }
 0x70f   : > { %1507 = vmatpush1.bf16.msra.mxu0 %v3518_v9  ;;  %1548 = vmatpush1.bf16.msra.mxu1 %v3522_v10  ;;  %v1473_v10 = vstv %s1352_s27 }
 0x710   : > { %1508 = vmatprep.subr.bf16.mxu0 %v3526_v11  ;;  %1549 = vmatprep.subr.bf16.mxu1 %v3530_v12 }
 0x713   : > { %1509 = vmatpush1.bf16.msra.mxu0 %v3534_v13  ;;  %1550 = vmatpush1.bf16.msra.mxu1 %v3538_v14  ;;  %v3596_v14 = vld [vmem:[#allocation4] sm:$0xff] }
 0x714   : > { %vm1474_vm6 = vcmp.gt.s32.totalorder %v3596_v14, %v1473_v10 }
 0x7c9   : > { %v1397_v47 = vpop.f32.mrb[24].mxu0  ;;  %v1438_v62 = vpop.f32.mrb[24].mxu1 }
 0x7ca   : > { %v1445_v63 = vadd.f32 %v1397_v47, %v1358_v36  ;;  %v1399_v0 = vpop.f32.mrb[25].mxu0  ;;  %v1440_v37 = vpop.f32.mrb[25].mxu1  ;;  %v1447_v31 = vadd.f32 %v1438_v62, %v1360_v46 }
 0x7cb   : > { %v1446_v39 = vadd.f32 %v1399_v0, %v1359_v57  ;;  %v1401_v40 = vpop.f32.mrb[26].mxu0  ;;  %v1442_v43 = vpop.f32.mrb[26].mxu1  ;;  %v1448_v49 = vadd.f32 %v1440_v37, %v1361_v48  ;;  %v1604_v37 = vstv %s1483_s1 }
 0x7cc   : > { %v2021_v54 = vmul.f32 -1.442695, %v1445_v63  ;;  %v1402_v59 = vpop.f32.mrb[27].mxu0  ;;  %v1443_v44 = vpop.f32.mrb[27].mxu1  ;;  %v2023_v50 = vmul.f32 -1.442695, %v1447_v31  ;;  %vm1605_vm7 = vcmp.gt.s32.totalorder %v3596_v14, %v1604_v37 }
 0x7cd   : > { %v2022_v45 = vmul.f32 -1.442695, %v1446_v39 }
 0x7ce   : > { %2330 = vpow2.f32 %v2021_v54 }
 0x7cf   : > { %2332 = vpow2.f32 %v2022_v45 }
 0x7d0   : > { %2334 = vtanh.f32 %v1448_v49 }
 0x7d1   : > { %2336 = vpow2.f32 %v2023_v50 }
 0x7d8   : > { %v2331_v51 = vpop.eup %2330 }
 0x7d9   : > { %v1458_v52 = vadd.f32 1.0, %v2331_v51  ;;  %v2333_v53 = vpop.eup %2332 }
 0x7da   : > { %v1459_v4 = vadd.f32 1.0, %v2333_v53  ;;  %v2335_v5 = vpop.eup %2334 }
 0x7db   : > { %2338 = vrcp.f32 %v1458_v52  ;;  %v2337_v6 = vpop.eup %2336 }
 0x7dc   : > { %2340 = vrcp.f32 %v1459_v4  ;;  %v1460_v12 = vadd.f32 1.0, %v2337_v6 }
 0x7de   : > { %2342 = vrcp.f32 %v1460_v12 }
 0x7e5   : > { %v2339_v8 = vpop.eup %2338 }
 0x7e6   : > { %v1469_v9 = vmul.f32 %v2339_v8, %v2335_v5  ;;  %v2341_v11 = vpop.eup %2340 }
 0x7e7   : > { %v1468_v13 = vmul.f32 %v2341_v11, %v3550_v19 }
 0x7e8   : > { %v2343_v28 = vpop.eup %2342 }
 0x7e9   : > { %v1470_v26 = vadd.f32 %v1469_v9, %v1468_v13 }
 0x7eb   : > { %2344 = vtanh.f32 %v1470_v26  ;;  %v1480_v27 = vsel %vm1474_vm6, %v1470_v26, %v3550_v19 }
 0x7f5   : > { %v2345_v29 = vpop.eup %2344 }
 0x7f6   : > { %v1472_v2 = vmul.f32 %v2345_v29, %v2343_v28 }
 0x7f8   : > { %v1475_v30 = vsel %vm1474_vm6, %v1472_v2, 0.0  ;;  %v1479_v32 = vsel %vm1474_vm6, %v1472_v2, %v3555_v24 }
 0x7f9   : > { %2025 = vst [vmem:[%s1806_s30 + $0x30] sm:$0xff] %v1475_v30  ;;  %v1493_v33 = vpack.c.bf16 %v1479_v32, %v1479_v32 }
 0x7fb   : > { %1527 = vmatmul.mubr.bf16.vlgmr.msra.gmra.mrb[28].mxu0 %v1493_v33  ;;  %1568 = vmatmul.mubr.bf16.vlgmr.msra.gmra.mrb[28].mxu1 %v1493_v33 }
 0x8ce   : > { %v1528_v55 = vpop.f32.mrb[28].mxu0  ;;  %v1569_v56 = vpop.f32.mrb[28].mxu1 }
 0x8cf   : > { %v1576_v1 = vadd.f32 %v1528_v55, %v1489_v34  ;;  %v1530_v58 = vpop.f32.mrb[29].mxu0  ;;  %v1571_v60 = vpop.f32.mrb[29].mxu1  ;;  %v1578_v22 = vadd.f32 %v1569_v56, %v1491_v20 }
 0x8d0   : > { %v1577_v61 = vadd.f32 %v1530_v58, %v1490_v41  ;;  %v1532_v15 = vpop.f32.mrb[30].mxu0  ;;  %v1573_v16 = vpop.f32.mrb[30].mxu1  ;;  %v1579_v23 = vadd.f32 %v1571_v60, %v1492_v21 }
 0x8d1   : > { %v2029_v17 = vmul.f32 -1.442695, %v1576_v1  ;;  %v1533_v18 = vpop.f32.mrb[31].mxu0  ;;  %v1574_v7 = vpop.f32.mrb[31].mxu1  ;;  %v2031_v24 = vmul.f32 -1.442695, %v1578_v22 }
 0x8d2   : > { %v2030_v19 = vmul.f32 -1.442695, %v1577_v61 }
 0x8d3   : > { %2346 = vpow2.f32 %v2029_v17 }
 0x8d4   : > { %2348 = vpow2.f32 %v2030_v19 }
 0x8d5   : > { %2350 = vtanh.f32 %v1579_v23 }
 0x8d6   : > { %2352 = vpow2.f32 %v2031_v24 }
 0x8dd   : > { %v2347_v25 = vpop.eup %2346 }
 0x8de   : > { %v1589_v3 = vadd.f32 1.0, %v2347_v25  ;;  %v2349_v36 = vpop.eup %2348 }
 0x8df   : > { %v1590_v57 = vadd.f32 1.0, %v2349_v36  ;;  %v2351_v47 = vpop.eup %2350 }
 0x8e0   : > { %2354 = vrcp.f32 %v1589_v3  ;;  %v2353_v62 = vpop.eup %2352 }
 0x8e1   : > { %2356 = vrcp.f32 %v1590_v57  ;;  %v1591_v39 = vadd.f32 1.0, %v2353_v62 }
 0x8e3   : > { %2358 = vrcp.f32 %v1591_v39 }
 0x8ea   : > { %v2355_v63 = vpop.eup %2354 }
 0x8eb   : > { %v1600_v0 = vmul.f32 %v2355_v63, %v2351_v47  ;;  %v2357_v38 = vpop.eup %2356 }
 0x8ec   : > { %v1599_v40 = vmul.f32 %v2357_v38, %v1480_v27 }
 0x8ed   : > { %v2359_v59 = vpop.eup %2358 }
 0x8ee   : > { %v1601_v43 = vadd.f32 %v1600_v0, %v1599_v40 }
 0x8f0   : > { %2360 = vtanh.f32 %v1601_v43  ;;  %v1611_v54 = vsel %vm1605_vm7, %v1601_v43, %v1480_v27 }
 0x8f1   : > { %1613 = vst [vmem:[#allocation3] sm:$0xff] %v1611_v54  ;;  %1619 = vst [vmem:[%s3779_s16] sm:$0xff] (!%p2034_p9), %v1611_v54 }
 0x8f8   : > { %1617 = sbr.rel (%p2034_p9) target bundleno = 2304 (0x900), region = 52 }
 0x8fa   : > { %v2361_v44 = vpop.eup %2360 }
 0x8fb   : > { %v1603_v45 = vmul.f32 %v2361_v44, %v2359_v59 }
 0x8fd   : > { %v1606_v46 = vsel %vm1605_vm7, %v1603_v45, 0.0  ;;  %v1610_v48 = vsel %vm1605_vm7, %v1603_v45, %v1479_v32 }
 0x8fe   : > { %2033 = vst [vmem:[%s1814_s5 + $0x38] sm:$0xff] %v1606_v46  ;;  %1612 = vst [vmem:[#allocation2] sm:$0xff] %v1610_v48 }
 0x8ff   : > { %1618 = vst [vmem:[%s342_s8] sm:$0xff] %v1610_v48 }
 0x900 PF: > { %s3824_s27 = sld [smem:[#allocation21_spill]]  ;;  %s3825_s12 = sld [smem:[#allocation32_spill]] }
 0x901   : > { %s1666_s23 = sshll.u32 %s342_s8, 4  ;;  %s3627_s3 = scalar_lea.sflag [#allocation12], %s295_s29  ;;  %s1667_s23 = int_to_ptr.vmem [resolvable:$true] %s1666_s23 }
 0x902   : > { %s2483_s13 = scalar_lea.vmem %s1667_s23, 128  ;;  %p3826_p2 = scmp.ne.s32.totalorder %s3804_s14, 0 }
 0x903   : > { %p2484_p11 = scmp.ne.s32.totalorder %s1667_s23, %s2483_s13  ;;  %s2682_s1 = smov [#allocation11]  }
 0x904   : > { %s2487_s7 = sshll.u32 %s2682_s1, 4  ;;  %s2488_s7 = int_to_ptr.vmem [resolvable:$false] %s2487_s7 }
 0x905   : > { %p2485_p8 = pnand %p2484_p11, %p3826_p2  ;;  %s2489_s5 = scalar_lea.vmem %s2488_s7, 256 }
 0x906   : > { %s2042_s4 = sshll.u32 %s3824_s27, 7  ;;  %p2490_p13 = scmp.lt.s32.totalorder %s1667_s23, %s2488_s7 }
 0x907   : > { %s3621_s9 = scalar_lea.hbm %s3825_s12, %s2042_s4  ;;  %p2486_p3 = pneg %p2485_p8 }
 0x908   : > { %p2491_p1 = scmp.lt.s32.totalorder %s2489_s5, %s2483_s13 }
 0x90a   : > { %p2492_p4 = por %p2491_p1, %p2490_p13 }
 0x90c   : > { %p2493_p12 = pnand %p2492_p4, %p2486_p3 }
 0x90e   : > { %2496 = shalt.err (!%p2493_p12)
}
 0x90f   : > { %s2497_s11 = scalar_lea.hbm %s3621_s9, 128  ;;  %s2501_s6 = scalar_lea.hbm %s3825_s12, 256 }
 0x910   : > { %p2498_p0 = scmp.ne.s32.totalorder %s3621_s9, %s2497_s11  ;;  %p2502_p7 = scmp.lt.u32.totalorder %s3621_s9, %s3825_s12 }
 0x911   : > { %p2503_p10 = scmp.lt.u32.totalorder %s2501_s6, %s2497_s11  ;;  %p2505_p11 = scmp.lt.u32.totalorder %s2497_s11, %s3621_s9 }
 0x912   : > { %p2499_p5 = pnand %p2498_p0, %p3826_p2 }
 0x913   : > { %p2504_p9 = por %p2503_p10, %p2502_p7 }
 0x914   : > { %p2500_p6 = pneg %p2499_p5 }
 0x915   : > { %p2506_p8 = por %p2505_p11, %p2504_p9 }
 0x917   : > { %p2507_p3 = pnand %p2506_p8, %p2500_p6 }
 0x919   : > { %2510 = shalt.err (!%p2507_p3)
}
 0x91a   : > { %2060 = dma.vmem_to_hbm [thread:$0]  (%p3826_p2), %s1667_s23, 128, %s3621_s9, %s3627_s3  }
 0x91b   : > { %s2050_s13 = sshll.u32 %s3194_s10, 4  ;;  %s1650_s7 = sshll.u32 %s3014_s17, 4  ;;  %s3650_s7 = int_to_ptr.vmem [resolvable:$true] %s1650_s7 }
 0x91c   : > { %s1647_s5 = sadd.s32 %s3824_s27, %s2050_s13  ;;  %s3827_s6 = sld [smem:[#allocation31_spill]] }
 0x91d   : > { %s2041_s11 = sshll.u32 %s1647_s5, 7  ;;  %s3828_s0 = sld [smem:[#allocation33_spill]] }
 0x91e   : > { %s1621_s10 = scalar_lea.sflag [#allocation6], %s2993_s25  ;;  %s2511_s17 = scalar_lea.vmem %s3650_s7, 1024 }
 0x91f   : > { %p2512_p13 = scmp.ne.s32.totalorder %s3650_s7, %s2511_s17  ;;  %p3829_p1 = scmp.ne.s32.totalorder %s3802_s24, 0 }
 0x920   : > { %s2683_s9 = smov [#allocation10]  }
 0x921   : > { %p2513_p4 = pnand %p2512_p13, %p3829_p1  ;;  %s2515_s23 = sshll.u32 %s2683_s9, 4  ;;  %s2516_s23 = int_to_ptr.vmem [resolvable:$false] %s2515_s23 }
 0x922   : > { %s3655_s30 = scalar_lea.hbm %s3827_s6, %s2041_s11  ;;  %s2517_s13 = scalar_lea.vmem %s2516_s23, 2048 }
 0x923   : > { %s3662_s2 = scalar_lea.hbm %s3828_s0, %s2042_s4  ;;  %p2514_p12 = pneg %p2513_p4 }
 0x924   : > { %p2518_p0 = scmp.lt.s32.totalorder %s3650_s7, %s2516_s23  ;;  %p2519_p5 = scmp.lt.s32.totalorder %s2517_s13, %s2511_s17 }
 0x926   : > { %p2520_p6 = por %p2519_p5, %p2518_p0 }
 0x928   : > { %p2521_p7 = pnand %p2520_p6, %p2514_p12 }
 0x92a   : > { %2524 = shalt.err (!%p2521_p7)
}
 0x92b   : > { %s2525_s16 = scalar_lea.hbm %s3655_s30, 1024  ;;  %s2529_s5 = scalar_lea.hbm %s3827_s6, 4096 }
 0x92c   : > { %p2526_p10 = scmp.ne.s32.totalorder %s3655_s30, %s2525_s16  ;;  %p2530_p8 = scmp.lt.u32.totalorder %s3655_s30, %s3827_s6 }
 0x92d   : > { %p2531_p3 = scmp.lt.u32.totalorder %s2529_s5, %s2525_s16  ;;  %p2533_p4 = scmp.lt.u32.totalorder %s2525_s16, %s3655_s30 }
 0x92e   : > { %p2527_p9 = pnand %p2526_p10, %p3829_p1 }
 0x92f   : > { %p2532_p13 = por %p2531_p3, %p2530_p8 }
 0x930   : > { %p2528_p11 = pneg %p2527_p9 }
 0x931   : > { %p2534_p12 = por %p2533_p4, %p2532_p13 }
 0x933   : > { %p2535_p0 = pnand %p2534_p12, %p2528_p11 }
 0x935   : > { %2538 = shalt.err (!%p2535_p0)
}
 0x936   : > { %s2684_s8 = smov 128   ;;  %s2685_s1 = smov 256  }
 0x937   : > { %s2686_s17 = smov 8   ;;  %s3830_s9 = scalar_lea.vmem [#allocation13], %s3012_s15 }
 0x938   : > { %2059 = dma.vmem_to_hbm [thread:$0]  (%p3829_p1), %s3650_s7, 1024, %s3655_s30, %s1621_s10, %s2684_s8, %s2685_s1, %s2686_s17  }
 0x939   : > { %s1679_s23 = sshll.u32 %s3830_s9, 4  ;;  %s2687_s16 = smov [#allocation13]   ;;  %s1680_s23 = int_to_ptr.vmem [resolvable:$true] %s1679_s23 }
 0x93a   : > { %s2539_s13 = scalar_lea.vmem %s1680_s23, 128  ;;  %s2543_s27 = sshll.u32 %s2687_s16, 4  ;;  %s2544_s27 = int_to_ptr.vmem [resolvable:$false] %s2543_s27 }
 0x93b   : > { %p2540_p5 = scmp.ne.s32.totalorder %s1680_s23, %s2539_s13  ;;  %s2545_s4 = scalar_lea.vmem %s2544_s27, 256 }
 0x93c   : > { %p2546_p10 = scmp.lt.s32.totalorder %s1680_s23, %s2544_s27  ;;  %p2547_p9 = scmp.lt.s32.totalorder %s2545_s4, %s2539_s13 }
 0x93d   : > { %p2541_p6 = pnand %p2540_p5, %p3826_p2 }
 0x93e   : > { %p2548_p11 = por %p2547_p9, %p2546_p10 }
 0x93f   : > { %p2542_p7 = pneg %p2541_p6 }
 0x941   : > { %p2549_p8 = pnand %p2548_p11, %p2542_p7 }
 0x943   : > { %2552 = shalt.err (!%p2549_p8)
}
 0x944   : > { %s2553_s24 = scalar_lea.hbm %s3662_s2, 128  ;;  %s2557_s7 = scalar_lea.hbm %s3828_s0, 256 }
 0x945   : > { %p2554_p1 = scmp.ne.s32.totalorder %s3662_s2, %s2553_s24  ;;  %p2558_p4 = scmp.lt.u32.totalorder %s3662_s2, %s3828_s0 }
 0x946   : > { %p2559_p12 = scmp.lt.u32.totalorder %s2557_s7, %s2553_s24  ;;  %p2561_p5 = scmp.lt.u32.totalorder %s2553_s24, %s3662_s2 }
 0x947   : > { %p2555_p3 = pnand %p2554_p1, %p3826_p2 }
 0x948   : > { %p2560_p0 = por %p2559_p12, %p2558_p4 }
 0x949   : > { %p2556_p13 = pneg %p2555_p3 }
 0x94a   : > { %p2562_p6 = por %p2561_p5, %p2560_p0 }
 0x94c   : > { %p2563_p7 = pnand %p2562_p6, %p2556_p13 }
 0x94e   : > { %2566 = shalt.err (!%p2563_p7)
}
 0x94f   : > { %2061 = dma.vmem_to_hbm [thread:$0]  (%p3826_p2), %s1680_s23, 128, %s3662_s2, %s3627_s3  }
 0x950 PF: > { %p2089_p10 = scmp.ge.s32.totalorder %s2673_s28, 2  ;;  %s1691_s5 = sand.u32 1, %s2645_s21  }
 0x951   : > { %p3831_p9 = scmp.ne.s32.totalorder %s3803_s18, 0  ;;  %s1692_s11 = scalar_lea.sflag [#allocation6], %s1691_s5 }
 0x953   : > { %p2077_p11 = pnand %p2089_p10, %p3831_p9 }
 0x955   : > { %2624 = dma.done.wait (!%p2077_p11), %s1692_s11, 1024  }
 0x956   : > { %2626 = vsyncadd (!%p2077_p11), %s1692_s11, 4294966272  ;;  %s3832_s29 = sadd.s32 4294967294, %s2673_s28   ;;  %p3833_p8 = scmp.ne.s32.totalorder %s3805_s26, 0 }
 0x957   : > { %s1700_s8 = sand.u32 1, %s3832_s29  }
 0x958   : > { %p2080_p1 = pnand %p2089_p10, %p3833_p8  ;;  %s1701_s14 = scalar_lea.sflag [#allocation12], %s1700_s8 }
 0x95a   : > { %2628 = dma.done.wait (!%p2080_p1), %s1701_s14, 256  }
 0x95b   : > { %2630 = vsyncadd (!%p2080_p1), %s1701_s14, 4294967040  ;;  %s26_s28 = sadd.s32 1, %s2673_s28   ;;  %s3834_s2 = sld [smem:[#allocation27_spill]] }
 0x95c   : > { %p23_p2 = scmp.ge.s32.totalorder %s26_s28, 6   ;;  %s3835_s3 = sld [smem:[#allocation19_spill]] }
 0x95d   : > { %s3836_s23 = sld [smem:[#allocation26_spill]]  ;;  %s3837_s24 = sld [smem:[#allocation22_spill]] }
 0x95e   : > { %s3838_s25 = sld [smem:[#allocation23_spill]]  ;;  %s3839_s26 = sld [smem:[#allocation24_spill]] }
 0x95f   : > { %s3840_s27 = sld [smem:[#allocation25_spill]]  ;;  %s3841_s18 = smov %s2637_s19 }
 0x960   : > { %s3842_s19 = smov %s2641_s20  ;;  %s3844_s21 = smov %s2649_s22 }
 0x961   : > { %s3843_s20 = smov %s3834_s2  ;;  %25 = sbr.rel (!%p23_p2) target bundleno = 19 (0x13), region = 149 }
 0x962   : > { %s3845_s22 = smov %s3835_s3 }
 0x968   :  { %1715 = vsyncpa [#allocation5], 1 }
 0x969   :  { %1717 = vsyncpa [#allocation5 + $0x1], 1 }
 0x96a   :  { %1718 = vsyncpa [#allocation8], 1 }
 0x96b   :  { %1720 = vsyncpa [#allocation8 + $0x1], 1 }
 0x96c   :  { %1721 = vsyncpa [#allocation6], 1 }
 0x96d   :  { %1723 = vsyncpa [#allocation6 + $0x1], 1 }
 0x96e   :  { %1724 = vsyncpa [#allocation12], 1 }
 0x96f   :  { %1726 = vsyncpa [#allocation12 + $0x1], 1 }

</bundles_post_ra>
